<compile_context>
chip_gen: v7x
topology: tpu7x:2x2x1
jax: 0.10.0
libtpu: 0.0.40
codegen_flags: <defaults>
</compile_context>

<pallas_src>
import jax
import jax.numpy as jnp
from jax import lax
from jax.experimental import pallas as pl
from jax.experimental.pallas import tpu as pltpu

IN_FEATURES = 196608   # fixed by the module definition
OUT_FEATURES = 16


def linear_kernel(x_ref, w_ref, o_ref):
    """One K-tile of the partial sum  o += x_tile @ w_tile.T.

    x_ref: [B, tk]  float32  (lane-dense along K; cast to bf16 for the MXU)
    w_ref: [N, tk]  bfloat16 (native PyTorch [N, K] layout, lane-dense along K)
    o_ref: [B, N]   float32  partial sum for this core-split slice
    """
    k = pl.program_id(1)

    @pl.when(k == 0)
    def _():
        o_ref[...] = jnp.zeros_like(o_ref)

    # bf16 x bf16 -> f32 accumulate on the MXU, contracting the last dim of
    # both operands (NT): no transposed weight copy is materialized in VMEM.
    o_ref[...] += lax.dot_general(
        x_ref[...].astype(jnp.bfloat16),
        w_ref[...],
        dimension_numbers=(((1,), (1,)), ((), ())),
        preferred_element_type=jnp.float32,
    )


def linear_pallas(x, w, b, *, core_split=2, k_steps=8):
    """y = x @ w.T + b  with w in native PyTorch layout [N, K].

    The K reduction is split as core_split ("parallel" grid axis) x k_steps
    ("arbitrary" inner reduction). Partial sums of shape [core_split, B, N]
    are combined (+bias) in the wrapper — a negligible [2, B, 16] epilogue.
    """
    B, K = x.shape
    N, Kw = w.shape
    assert K == Kw, "weight K dim must match x"
    assert K % (core_split * k_steps) == 0, "K must divide into the tile grid"
    tk = K // (core_split * k_steps)
    assert tk % 128 == 0, "K tile must be lane-aligned (multiple of 128)"

    # Stream the weight in bf16 (convert once; callers doing repeated inference
    # should pre-convert and pass a bf16 weight to avoid re-casting per call).
    if w.dtype != jnp.bfloat16:
        w = w.astype(jnp.bfloat16)

    out_bytes = core_split * B * N * 4
    cost = pl.CostEstimate(
        flops=2 * B * K * N,
        transcendentals=0,
        bytes_accessed=x.nbytes + w.nbytes + out_bytes,
    )

    partials = pl.pallas_call(
        linear_kernel,
        out_shape=jax.ShapeDtypeStruct((core_split, B, N), jnp.float32),
        grid_spec=pltpu.PrefetchScalarGridSpec(
            num_scalar_prefetch=0,
            grid=(core_split, k_steps),
            in_specs=[
                # x K-tile: [B, tk] f32, lane-dense along K.
                # (B=2 is sublane-padded to 8 in VMEM; keep B a multiple of 8
                #  if the batch ever grows.)
                pl.BlockSpec((B, tk), lambda c, k: (0, c * k_steps + k)),
                # weight K-tile, native [N, K] layout, bf16: [N, tk].
                pl.BlockSpec((N, tk), lambda c, k: (0, c * k_steps + k)),
            ],
            # One partial-sum slab per core-split slice; accumulator is the
            # resident output block (same block index across the k axis).
            out_specs=pl.BlockSpec((None, B, N), lambda c, k: (c, 0, 0)),
        ),
        compiler_params=pltpu.CompilerParams(
            dimension_semantics=("parallel", "arbitrary"),
            vmem_limit_bytes=32 * 1024 * 1024,
        ),
        cost_estimate=cost,
    )(x, w)

    # Tiny [B, N] combine: sum the core-split partials and add the bias.
    return partials.sum(axis=0) + b[None, :]


def init_params(key):
    """Deterministic init mimicking nn.Linear default (U(-1/sqrt(K), 1/sqrt(K)))."""
    kw, kb = jax.random.split(key)
    bound = 1.0 / jnp.sqrt(jnp.float32(IN_FEATURES))
    weight = jax.random.uniform(
        kw, (OUT_FEATURES, IN_FEATURES), jnp.float32, -bound, bound
    )
    bias = jax.random.uniform(kb, (OUT_FEATURES,), jnp.float32, -bound, bound)
    return weight, bias


if __name__ == "__main__":
    key = jax.random.PRNGKey(0)
    k_x, k_p = jax.random.split(key)

    batch = 2
    x = jax.random.normal(k_x, (batch, IN_FEATURES), jnp.float32)
    weight, bias = init_params(k_p)   # weight kept in native [N, K] layout (f32)

    y = linear_pallas(x, weight, bias)
    y = jax.block_until_ready(y)
    assert y.shape == (batch, OUT_FEATURES)

    # Tight check against a bf16-operand reference (same numerics as the kernel,
    # f32 accumulation): verifies the tiling / accumulation logic exactly.
    y_ref_bf16 = (
        jnp.dot(
            x.astype(jnp.bfloat16),
            weight.astype(jnp.bfloat16).T,
            preferred_element_type=jnp.float32,
        )
        + bias[None, :]
    )
    assert jnp.allclose(y, y_ref_bf16, atol=1e-3, rtol=1e-3), "mismatch vs bf16 reference"

    # Looser check against the f32 PyTorch-equivalent reference: bf16 operand
    # rounding over K=196608 terms introduces ~1e-3..5e-3 absolute error.
    y_ref_f32 = x @ weight.T + bias[None, :]
    assert jnp.allclose(y, y_ref_f32, atol=2e-2, rtol=2e-2), "mismatch vs f32 reference"

    print("KERNEL_OK")
</pallas_src>

<mosaic_0001>
module attributes {stable_mosaic.version = 11 : i64} {
  func.func @linear_kernel(%arg0: i32, %arg1: i32, %arg2: memref<2x12288xf32, #tpu.memory_space<vmem>>, %arg3: memref<16x12288xbf16, #tpu.memory_space<vmem>>, %arg4: memref<1x2x16xf32, #tpu.memory_space<vmem>>) attributes {dimension_semantics = [#tpu.dimension_semantics<parallel>, #tpu.dimension_semantics<arbitrary>], iteration_bounds = array<i64: 2, 8>, scalar_prefetch = 0 : i64, scratch_operands = 0 : i64, tpu.core_type = #tpu.core_type<tc>, window_params = [{transform_indices = @transform_0, window_bounds = array<i64: 2, 12288>}, {transform_indices = @transform_1, window_bounds = array<i64: 16, 12288>}, {transform_indices = @transform_2, window_bounds = array<i64: 1, 2, 16>}]} {
    %c0_i32 = arith.constant 0 : i32
    %0 = arith.cmpi eq, %arg1, %c0_i32 : i32
    %1 = arith.extui %0 : i1 to i32
    %c0_i32_0 = arith.constant 0 : i32
    %2 = arith.cmpi ne, %1, %c0_i32_0 : i32
    scf.if %2 {
      %cst_10 = arith.constant 0.000000e+00 : f32
      %13 = vector.broadcast %cst_10 : f32 to vector<2x16xf32>
      %c0_11 = arith.constant 0 : index
      %c0_12 = arith.constant 0 : index
      %c0_13 = arith.constant 0 : index
      %14 = vector.load %arg4[%c0_11, %c0_12, %c0_13] : memref<1x2x16xf32, #tpu.memory_space<vmem>>, vector<1x2x16xf32>
      %15 = vector.shape_cast %14 : vector<1x2x16xf32> to vector<2x16xf32>
      %16 = vector.shape_cast %13 : vector<2x16xf32> to vector<1x2x16xf32>
      tpu.vector_store %arg4[%c0_11, %c0_12, %c0_13], %16 {strides = array<i32>} : memref<1x2x16xf32, #tpu.memory_space<vmem>>, vector<1x2x16xf32>,
    } else {
    }
    %c0 = arith.constant 0 : index
    %c0_1 = arith.constant 0 : index
    %c0_2 = arith.constant 0 : index
    %3 = vector.load %arg4[%c0, %c0_1, %c0_2] : memref<1x2x16xf32, #tpu.memory_space<vmem>>, vector<1x2x16xf32>
    %4 = vector.shape_cast %3 : vector<1x2x16xf32> to vector<2x16xf32>
    %c0_3 = arith.constant 0 : index
    %c0_4 = arith.constant 0 : index
    %5 = vector.load %arg2[%c0_3, %c0_4] : memref<2x12288xf32, #tpu.memory_space<vmem>>, vector<2x12288xf32>
    %6 = arith.truncf %5 : vector<2x12288xf32> to vector<2x12288xbf16>
    %c0_5 = arith.constant 0 : index
    %c0_6 = arith.constant 0 : index
    %7 = vector.load %arg3[%c0_5, %c0_6] : memref<16x12288xbf16, #tpu.memory_space<vmem>>, vector<16x12288xbf16>
    %cst = arith.constant dense<0.000000e+00> : vector<2x16xf32>
    %8 = tpu.matmul %6, %7, %cst {dimension_numbers = #tpu.dot_dimension_numbers<[1], [1], [0], [0], [0, 0, 1, 0], [], []>} : vector<2x12288xbf16>, vector<16x12288xbf16>, vector<2x16xf32> -> vector<2x16xf32>
    %9 = arith.addf %4, %8 : vector<2x16xf32>
    %c0_7 = arith.constant 0 : index
    %c0_8 = arith.constant 0 : index
    %c0_9 = arith.constant 0 : index
    %10 = vector.load %arg4[%c0_7, %c0_8, %c0_9] : memref<1x2x16xf32, #tpu.memory_space<vmem>>, vector<1x2x16xf32>
    %11 = vector.shape_cast %10 : vector<1x2x16xf32> to vector<2x16xf32>
    %12 = vector.shape_cast %9 : vector<2x16xf32> to vector<1x2x16xf32>
    tpu.vector_store %arg4[%c0_7, %c0_8, %c0_9], %12 {strides = array<i32>} : memref<1x2x16xf32, #tpu.memory_space<vmem>>, vector<1x2x16xf32>,
    return
  }
  func.func @transform_0(%arg0: i32, %arg1: i32) -> (i32, i32) {
    %c8_i32 = arith.constant 8 : i32
    %0 = arith.muli %arg0, %c8_i32 : i32
    %1 = arith.addi %0, %arg1 : i32
    %c0_i32 = arith.constant 0 : i32
    %c0_i32_0 = arith.constant 0 : i32
    return %c0_i32, %1 : i32, i32
  }
  func.func @transform_1(%arg0: i32, %arg1: i32) -> (i32, i32) {
    %c8_i32 = arith.constant 8 : i32
    %0 = arith.muli %arg0, %c8_i32 : i32
    %1 = arith.addi %0, %arg1 : i32
    %c0_i32 = arith.constant 0 : i32
    %c0_i32_0 = arith.constant 0 : i32
    return %c0_i32, %1 : i32, i32
  }
  func.func @transform_2(%arg0: i32, %arg1: i32) -> (i32, i32, i32) {
    %c0_i32 = arith.constant 0 : i32
    %c0_i32_0 = arith.constant 0 : i32
    %c0_i32_1 = arith.constant 0 : i32
    return %arg0, %c0_i32, %c0_i32_0 : i32, i32, i32
  }
}

</mosaic_0001>

<bundles_post_ra>
// kernel: tpu_custom_call.1
= control target key start
LH: loop header
LB: loop body
LE: loop exit
PB: predicated region body
PF: predicated region fallthrough
CT: control target
= control target key end

     0   :  { %7 = vsyncpa [#allocation3], 0  ;;  %s4431_s0 = inlined_call_operand.hbm [shape: f32[2,196608], index: 0, kind: input, shape index: {}]   ;;  %s4432_s1 = inlined_call_operand.hbm [shape: bf16[16,196608], index: 1, kind: input, shape index: {}]   ;;  %s4433_s2 = inlined_call_operand.hbm [shape: f32[2,2,16], index: 2, kind: output, shape index: {}]  }
   0x1   :  { %9 = vsyncpa [#allocation3 + $0x1], 0 }
   0x2   :  { %10 = vsyncpa [#allocation6], 0 }
   0x3   :  { %12 = vsyncpa [#allocation6 + $0x1], 0 }
   0x4   :  { %13 = vsyncpa [#allocation4], 0 }
   0x5   :  { %15 = vsyncpa [#allocation4 + $0x1], 0  ;;  %s3975_s9 = smov 0   ;;  %s3977_s10 = smov 0  }
   0x6   :  { %s3979_s11 = smov 0   ;;  %s3981_s12 = smov 0  }
   0x7   :  { %s3983_s13 = smov 0   ;;  %s3985_s14 = smov 0  }
   0x8   :  { %s3987_s15 = smov 0   ;;  %s3989_s16 = smov 0  }
   0x9   :  { %s3991_s17 = smov 0   ;;  %s3993_s18 = smov 0  }
   0xa   :  { %s3995_s19 = smov 0  }
   0xb LB: > { %4440 = sst [smem:[#allocation11_spill]] %s3942_s17  ;;  %s3507_s20 = sadd.s32 4294967295, %s3950_s19   ;;  %s3950_s19 = sphi %s3995_s19, %s21_s19   ;;  %s3946_s18 = sphi %s3993_s18, %s4456_s18   ;;  %s3942_s17 = sphi %s3991_s17, %s4455_s17   ;;  %s3938_s16 = sphi %s3989_s16, %s4454_s16   ;;  %s3934_s15 = sphi %s3987_s15, %s4453_s15   ;;  %s3930_s14 = sphi %s3985_s14, %s4462_s14   ;;  %s3926_s13 = sphi %s3983_s13, %s4461_s13   ;;  %s3922_s12 = sphi %s3981_s12, %s4460_s12   ;;  %s3918_s11 = sphi %s3979_s11, %s4459_s11   ;;  %s3914_s10 = sphi %s3977_s10, %s4458_s10   ;;  %s3910_s9 = sphi %s3975_s9, %s4457_s9  }
   0xc   : > { %4441 = sst [smem:[#allocation12_spill]] %s3946_s18  ;;  %s3508_s21 = sadd.s32 4294967294, %s3950_s19  }
   0xd   : > { %s30_s22 = sadd.s32 1, %s3942_s17  ;;  %s33_s23 = sadd.s32 1, %s3946_s18 }
   0xe   : > { %p31_p0 = scmp.ge.s32.totalorder %s30_s22, 8  ;;  %s3509_s24 = sshll.u32 %s3946_s18, 3 }
   0xf   : > { %s4034_s25 = sadd.s32 %s3942_s17, %s3509_s24  ;;  %s44_s26 = sadd.s32 1, %s3930_s14 }
  0x10   : > { %s4464_s22 = smov (%p31_p0, %s30_s22), 0  ;;  %s4466_s23 = smov (!%p31_p0, %s33_s23), %s3946_s18 }
  0x11   : > { %4442 = sst [smem:[#allocation13_spill]] %s4464_s22  ;;  %p51_p1 = scmp.ne.s32.totalorder %s3930_s14, %s3926_s13 }
  0x12   : > { %p52_p2 = scmp.eq.s32.totalorder %s3950_s19, 0  ;;  %p35_p3 = scmp.ge.s32.totalorder %s4466_s23, 2 }
  0x13   : > { %p57_p4 = scmp.ne.s32.totalorder %s3926_s13, %s3922_s12  ;;  %p58_p6 = scmp.eq.s32.totalorder %s3507_s20, 0 }
  0x14   : > { %p4044_p5 = por %p52_p2, %p51_p1  ;;  %s4468_s23 = smov (%p35_p3, %s4466_s23), 0 }
  0x15   : > { %4444 = sst [smem:[#allocation14_spill]] %s4468_s23  ;;  %p4050_p7 = por %p58_p6, %p57_p4 }
  0x16   : > { %s100_s29 = sadd.s32 1, %s3918_s11  ;;  %s3510_s30 = sshll.u32 %s4468_s23, 3 }
  0x17   : > { %s4445_s28 = scalar_select %p4050_p7, 1, 0 }
  0x18   : > { %s97_s3 = ssub.s32 %s3946_s18, %s4468_s23  ;;  %s40_s4 = sadd.s32 %s3510_s30, %s4464_s22 }
  0x19   : > { %p98_p8 = scmp.eq.s32.totalorder %s97_s3, 0  ;;  %s41_s5 = ssub.s32 %s4034_s25, %s40_s4 }
  0x1a   : > { %p110_p9 = scmp.ne.s32.totalorder %s3918_s11, %s3914_s10  ;;  %p42_p10 = scmp.eq.s32.totalorder %s41_s5, 0 }
  0x1b   : > { %p111_p11 = scmp.eq.s32.totalorder %s3507_s20, 15  ;;  %p116_p13 = scmp.ne.s32.totalorder %s3914_s10, %s3910_s9 }
  0x1c   : > { %s4063_s6 = scalar_select %p98_p8, %s3918_s11, %s100_s29  }
  0x1d   : > { %s4066_s7 = scalar_select %p42_p10, %s3930_s14, %s44_s26  }
  0x1e   : > { %p4068_p12 = por %p111_p11, %p110_p9  ;;  %p117_p0 = scmp.eq.s32.totalorder %s3508_s21, 15 }
  0x1f   : > { %p3645_p1 = scmp.lt.s32.totalorder %s3950_s19, 16  ;;  %s4078_s12 = sand.u32 1, %s3930_s14  }
  0x20   : > { %s4446_s8 = scalar_select %p4068_p12, 1, 0 }
  0x21   : > { %p4080_p2 = por %p117_p0, %p116_p13  ;;  %s3624_s20 = smul.u32 192, %s4078_s12 }
  0x22   : > { %p4087_p3 = pnand %p3645_p1, %p4044_p5  ;;  %s3622_s29 = smul.u32 3072, %s4034_s25 }
  0x23   : > { %s4447_s24 = scalar_select %p4080_p2, 1, 0 }
  0x24   : > { %s4095_s3 = scalar_lea.hbm %s4431_s0, %s3622_s29  ;;  %s141_s4 = scalar_lea.vmem [#allocation2], %s3624_s20 }
  0x25   : > { %s151_s5 = sshll.u32 %s141_s4, 4  ;;  %s3625_s27 = smul.u32 768, %s4078_s12  ;;  %s4097_s5 = int_to_ptr.vmem [resolvable:$true] %s151_s5 }
  0x26   : > { %s138_s23 = scalar_lea.sflag [#allocation3], %s4078_s12  ;;  %s3764_s22 = scalar_lea.hbm %s4095_s3, 3072 }
  0x27   : > { %p3765_p4 = scmp.ne.s32.totalorder %s4095_s3, %s3764_s22  ;;  %p3766_p5 = pneg %p4087_p3 }
  0x28   : > { %s3769_s30 = scalar_lea.hbm %s4431_s0, 49152  ;;  %p3770_p9 = scmp.lt.u32.totalorder %s4095_s3, %s4431_s0 }
  0x29   : > { %p3767_p6 = pnand %p3766_p5, %p3765_p4  ;;  %p3771_p10 = scmp.lt.u32.totalorder %s3769_s30, %s3764_s22 }
  0x2a   : > { %p3773_p13 = scmp.lt.u32.totalorder %s3764_s22, %s4095_s3 }
  0x2b   : > { %p3768_p8 = pneg %p3767_p6  ;;  %p3772_p11 = por %p3771_p10, %p3770_p9 }
  0x2d   : > { %p3774_p0 = por %p3773_p13, %p3772_p11 }
  0x2f   : > { %p3775_p1 = pnand %p3774_p0, %p3768_p8 }
  0x31   : > { %3778 = shalt.err (!%p3775_p1)
}
  0x32   : > { %s3779_s20 = scalar_lea.vmem %s4097_s5, 3072  ;;  %s3952_s4 = smov [#allocation2]  }
  0x33   : > { %p3780_p4 = scmp.ne.s32.totalorder %s4097_s5, %s3779_s20  ;;  %s3784_s29 = sshll.u32 %s3952_s4, 4  ;;  %s3785_s29 = int_to_ptr.vmem [resolvable:$false] %s3784_s29 }
  0x34   : > { %s3786_s17 = scalar_lea.vmem %s3785_s29, 6144  ;;  %p3787_p12 = scmp.lt.s32.totalorder %s4097_s5, %s3785_s29 }
  0x35   : > { %p3782_p6 = pnand %p3780_p4, %p3766_p5  ;;  %p3788_p9 = scmp.lt.s32.totalorder %s3786_s17, %s3779_s20 }
  0x37   : > { %p3783_p2 = pneg %p3782_p6  ;;  %p3789_p10 = por %p3788_p9, %p3787_p12 }
  0x39   : > { %p3790_p11 = pnand %p3789_p10, %p3783_p2 }
  0x3b   : > { %3793 = shalt.err (!%p3790_p11)
}
  0x3c   : > { %3637 = dma.hbm_to_vmem [thread:$0]  (!%p4087_p3), %s4095_s3, 3072, %s4097_s5, %s138_s23  }
  0x3d   : > { %s3623_s18 = smul.u32 6144, %s4034_s25  ;;  %p3519_p8 = scmp.ge.s32.totalorder %s3950_s19, 1 }
  0x3e   : > { %p179_p13 = scmp.lt.s32.totalorder %s3950_s19, 17  ;;  %s162_s20 = scalar_lea.vmem [#allocation5], %s3625_s27 }
  0x3f   : > { %s4132_s30 = scalar_lea.hbm %s4432_s1, %s3623_s18  ;;  %s171_s4 = sshll.u32 %s162_s20, 4  ;;  %s4140_s4 = int_to_ptr.vmem [resolvable:$true] %s171_s4 }
  0x40   : > { %p4136_p12 = pnand %p3519_p8, %p179_p13  ;;  %s159_s23 = scalar_lea.sflag [#allocation6], %s4078_s12 }
  0x41   : > { %s3794_s25 = scalar_lea.hbm %s4132_s30, 12288  ;;  %s3799_s17 = scalar_lea.hbm %s4432_s1, 196608 }
  0x42   : > { %p3795_p2 = scmp.ne.s32.totalorder %s4132_s30, %s3794_s25  ;;  %p3800_p4 = scmp.lt.u32.totalorder %s4132_s30, %s4432_s1 }
  0x43   : > { %p3801_p6 = scmp.lt.u32.totalorder %s3799_s17, %s3794_s25  ;;  %p3803_p10 = scmp.lt.u32.totalorder %s3794_s25, %s4132_s30 }
  0x44   : > { %p3797_p0 = pnand %p3795_p2, %p3766_p5 }
  0x45   : > { %p3802_p9 = por %p3801_p6, %p3800_p4 }
  0x46   : > { %p3798_p1 = pneg %p3797_p0 }
  0x47   : > { %p3804_p11 = por %p3803_p10, %p3802_p9 }
  0x49   : > { %p3805_p8 = pnand %p3804_p11, %p3798_p1 }
  0x4b   : > { %3808 = shalt.err (!%p3805_p8)
}
  0x4c   : > { %s3809_s22 = scalar_lea.vmem %s4140_s4, 12288  ;;  %s3953_s21 = smov [#allocation5]  }
  0x4d   : > { %p3810_p13 = scmp.ne.s32.totalorder %s4140_s4, %s3809_s22  ;;  %s3814_s20 = sshll.u32 %s3953_s21, 4  ;;  %s3815_s20 = int_to_ptr.vmem [resolvable:$false] %s3814_s20 }
  0x4e   : > { %s3816_s3 = scalar_lea.vmem %s3815_s20, 24576  ;;  %p3817_p7 = scmp.lt.s32.totalorder %s4140_s4, %s3815_s20 }
  0x4f   : > { %p3812_p2 = pnand %p3810_p13, %p3766_p5  ;;  %p3818_p4 = scmp.lt.s32.totalorder %s3816_s3, %s3809_s22 }
  0x51   : > { %p3813_p0 = pneg %p3812_p2  ;;  %p3819_p6 = por %p3818_p4, %p3817_p7 }
  0x53   : > { %p3820_p9 = pnand %p3819_p6, %p3813_p0 }
  0x55   : > { %3823 = shalt.err (!%p3820_p9)
}
  0x56   : > { %s3954_s25 = smov 98304   ;;  %s3955_s5 = smov 6144  }
  0x57   : > { %s3956_s17 = smov 384   ;;  %183 = sbr.rel (%p4136_p12) target bundleno = 538 (0x21a), region = 28 }
  0x58   : > { %3640 = dma.hbm_to_vmem [thread:$0]  (!%p4087_p3), %s4132_s30, 12288, %s4140_s4, %s159_s23, %s3954_s25, %s3955_s5, %s3956_s17  }
  0x59   : > { %s185_s18 = sand.u32 (!%p4136_p12), 1, %s3926_s13   ;;  %p4450_p7 = scmp.ne.s32.totalorder (!%p4136_p12), %s4445_s28, 0 }
  0x5a   : > { %s3626_s27 = smul.u32 (!%p4136_p12), 192, %s185_s18  ;;  %s186_s22 = scalar_lea.sflag (!%p4136_p12), [#allocation3], %s185_s18 }
  0x5c   : > { %s4171_s21 = scalar_lea.vmem (!%p4136_p12), [#allocation2], %s3626_s27 }
  0x5e   : > { %3897 = dma.done.wait (%p4450_p7), %s186_s22, 3072  }
  0x5f   : > { %3899 = vsyncadd (%p4450_p7), %s186_s22, 4294964224  ;;  %s3627_s20 = smul.u32 768, %s185_s18  ;;  %s195_s26 = scalar_lea.sflag [#allocation6], %s185_s18 }
  0x61   : > { %s4177_s12 = scalar_lea.vmem [#allocation5], %s3627_s20 }
  0x62   : > { %3901 = dma.done.wait (%p4450_p7), %s195_s26, 12288  }
  0x63   : > { %3903 = vsyncadd (%p4450_p7), %s195_s26, 4294955008  ;;  %s221_s30 = sand.u32 1, %s3914_s10   ;;  %p3521_p3 = scmp.ne.s32.totalorder %s3934_s15, 0 }
  0x64   : > { %s3520_s4 = sshll.u32 %s221_s30, 1  ;;  %vm235_vm0 = vcmask (!%p3521_p3), 123904   ;;  %v3957_v0 = vmov (!%p3521_p3), 0.0  }
  0x65   : > { %s4186_s29 = scalar_lea.vmem [#allocation7], %s3520_s4  ;;  %234 = sbr.rel (%p3521_p3) target bundleno = 108 (0x6c), region = 40 }
  0x66   : > { %236 = vst.msk [vmem:[%s4186_s29] sm:$0x3] (!%p3521_p3), %vm235_vm0, %v3957_v0 }
  0x6c PF: > { %v886_v1 = vld [vmem:[%s4177_s12] sm:$0xff]  ;;  %v887_v3 = vld [vmem:[%s4177_s12 + $0x8] sm:$0xff]  ;;  %v290_v4 = vlaneseq  ;;  %v3958_v9 = vmov 1983009808   ;;  %v888_v11 = vld [vmem:[%s4177_s12 + $0x10] sm:$0xff]  ;;  %s3619_s15 = sshll.u32 %s3938_s16, 5 }
  0x6d   : > { %v934_v2 = vld [vmem:[%s4177_s12 + $0x180] sm:$0xff]  ;;  %v935_v7 = vld [vmem:[%s4177_s12 + $0x188] sm:$0xff]  ;;  %v288_v10 = vunpack.c.l.s4 %v3958_v9  ;;  %v936_v15 = vld [vmem:[%s4177_s12 + $0x190] sm:$0xff]  ;;  %s3399_s28 = sshll.u32 %s4186_s29, 4  ;;  %vm3383_vm1 = vcmask 123904   ;;  %s4366_s25 = scalar_lea.hbm %s4433_s2, %s3619_s15  ;;  %s4368_s28 = int_to_ptr.vmem [resolvable:$true] %s3399_s28 }
  0x6e   : > { %v3523_v5 = vcombine.high %v886_v1, %v934_v2  ;;  %v3522_v6 = vcombine.low %v886_v1, %v934_v2  ;;  %v238_v8 = vld [vmem:[%s4171_s21] sm:$0xff]  ;;  %v3525_v12 = vcombine.high %v887_v3, %v935_v7  ;;  %v3524_v13 = vcombine.low %v887_v3, %v935_v7  ;;  %v889_v16 = vld [vmem:[%s4177_s12 + $0x18] sm:$0xff]  ;;  %v239_v21 = vld [vmem:[%s4171_s21 + $0x8] sm:$0xff]  ;;  %s3386_s5 = scalar_lea.sflag [#allocation4], %s221_s30  ;;  %s3824_s16 = scalar_lea.vmem %s4368_s28, 32 }
  0x6f   : > { %v291_v14 = vshrl.u32 %v290_v4, 7  ;;  %v937_v17 = vld [vmem:[%s4177_s12 + $0x198] sm:$0xff]  ;;  %v289_v18 = vunpack.c.0.s8 %v288_v10  ;;  %v286_v19 = vcombine.high %v238_v8, %v238_v8  ;;  %v3527_v20 = vcombine.high %v888_v11, %v936_v15  ;;  %v240_v25 = vld [vmem:[%s4171_s21 + $0x10] sm:$0xff]  ;;  %v890_v33 = vld [vmem:[%s4177_s12 + $0x20] sm:$0xff]  ;;  %p3825_p5 = scmp.ne.s32.totalorder %s4368_s28, %s3824_s16  ;;  %p4451_p12 = scmp.ne.s32.totalorder %s4446_s8, 0 }
  0x70   : > { %1462 = vmatprep.subr.bf16.mxu0 %v3523_v5  ;;  %1502 = vmatprep.subr.bf16.mxu1 %v3525_v12  ;;  %v3529_v22 = vcombine.high %v889_v16, %v937_v17  ;;  %v303_v23 = vcombine.high %v239_v21, %v239_v21  ;;  %v320_v30 = vcombine.high %v240_v25, %v240_v25  ;;  %v938_v38 = vld [vmem:[%s4177_s12 + $0x1a0] sm:$0xff]  ;;  %v891_v39 = vld [vmem:[%s4177_s12 + $0x28] sm:$0xff]  ;;  %v241_v51 = vld [vmem:[%s4171_s21 + $0x18] sm:$0xff]  ;;  %s3959_s17 = smov [#allocation7]  }
  0x71   : > { %1463 = vmatpush1.bf16.xpose.msra.mxu0 %v3522_v6  ;;  %1503 = vmatpush1.bf16.xpose.msra.mxu1 %v3524_v13  ;;  %v4200_v24 = vsub.s32 %v289_v18, %v291_v14  ;;  %v939_v40 = vld [vmem:[%s4177_s12 + $0x1a8] sm:$0xff]  ;;  %v3526_v43 = vcombine.low %v888_v11, %v936_v15  ;;  %v3528_v44 = vcombine.low %v889_v16, %v937_v17  ;;  %v892_v55 = vld [vmem:[%s4177_s12 + $0x30] sm:$0xff]  ;;  %v893_v59 = vld [vmem:[%s4177_s12 + $0x38] sm:$0xff]  ;;  %p3826_p1 = pnand %p3825_p5, %p4451_p12  ;;  %s3828_s18 = sshll.u32 %s3959_s17, 4  ;;  %s3829_s18 = int_to_ptr.vmem [resolvable:$false] %s3828_s18 }
  0x72   : > { %1542 = vmatprep.subr.bf16.mxu0 %v3527_v20  ;;  %1582 = vmatprep.subr.bf16.mxu1 %v3529_v22  ;;  %v3531_v49 = vcombine.high %v890_v33, %v938_v38  ;;  %v3533_v50 = vcombine.high %v891_v39, %v939_v40  ;;  %v337_v54 = vcombine.high %v241_v51, %v241_v51  ;;  %v940_v58 = vld [vmem:[%s4177_s12 + $0x1b0] sm:$0xff]  ;;  %v941_v60 = vld [vmem:[%s4177_s12 + $0x1b8] sm:$0xff]  ;;  %v242_v5 = vld [vmem:[%s4171_s21 + $0x20] sm:$0xff]  ;;  %s3830_s27 = scalar_lea.vmem %s3829_s18, 64  ;;  %p3831_p11 = scmp.lt.s32.totalorder %s4368_s28, %s3829_s18 }
  0x73   : > { %v293_v26 = vrot.slane %v238_v8, %v4200_v24  ;;  %v300_v27 = vrot.slane %v286_v19, %v4200_v24  ;;  %v310_v28 = vrot.slane %v239_v21, %v4200_v24  ;;  %v317_v29 = vrot.slane %v303_v23, %v4200_v24  ;;  %v894_v9 = vld [vmem:[%s4177_s12 + $0x40] sm:$0xff]  ;;  %v895_v13 = vld [vmem:[%s4177_s12 + $0x48] sm:$0xff]  ;;  %p3827_p10 = pneg %p3826_p1  ;;  %p3832_p8 = scmp.lt.s32.totalorder %s3830_s27, %s3824_s16 }
  0x74   : > { %v327_v47 = vrot.slane %v240_v25, %v4200_v24  ;;  %v334_v48 = vrot.slane %v320_v30, %v4200_v24  ;;  %v3530_v61 = vcombine.low %v890_v33, %v938_v38  ;;  %v3532_v62 = vcombine.low %v891_v39, %v939_v40  ;;  %v942_v12 = vld [vmem:[%s4177_s12 + $0x1c0] sm:$0xff]  ;;  %v943_v14 = vld [vmem:[%s4177_s12 + $0x1c8] sm:$0xff]  ;;  %v945_v33 = vld [vmem:[%s4177_s12 + $0x1d8] sm:$0xff] }
  0x75   : > { %v301_v31 = vcombine.high %v293_v26, %v293_v26  ;;  %v302_v32 = vcombine.high %v300_v27, %v300_v27  ;;  %v790_v34 = vpack.c.bf16 %v293_v26, %v293_v26  ;;  %v792_v35 = vpack.c.bf16 %v300_v27, %v300_v27  ;;  %v243_v23 = vld [vmem:[%s4171_s21 + $0x28] sm:$0xff]  ;;  %p3833_p13 = por %p3832_p8, %p3831_p11 }
  0x76   : > { %v318_v36 = vcombine.high %v310_v28, %v310_v28  ;;  %v319_v37 = vcombine.high %v317_v29, %v317_v29  ;;  %v335_v52 = vcombine.high %v327_v47, %v327_v47  ;;  %v336_v53 = vcombine.high %v334_v48, %v334_v48 }
  0x77   : > { %v791_v41 = vpack.c.bf16 %v301_v31, %v301_v31  ;;  %v793_v42 = vpack.c.bf16 %v302_v32, %v302_v32  ;;  %v794_v56 = vpack.c.bf16 %v310_v28, %v310_v28  ;;  %v796_v57 = vpack.c.bf16 %v317_v29, %v317_v29  ;;  %v896_v28 = vld [vmem:[%s4177_s12 + $0x50] sm:$0xff]  ;;  %v897_v32 = vld [vmem:[%s4177_s12 + $0x58] sm:$0xff]  ;;  %p3834_p2 = pnand %p3833_p13, %p3827_p10 }
  0x78   : > { %v795_v45 = vpack.c.bf16 %v318_v36, %v318_v36  ;;  %v797_v46 = vpack.c.bf16 %v319_v37, %v319_v37  ;;  %v799_v63 = vpack.c.bf16 %v335_v52, %v335_v52  ;;  %v801_v0 = vpack.c.bf16 %v336_v53, %v336_v53  ;;  %v944_v31 = vld [vmem:[%s4177_s12 + $0x1d0] sm:$0xff] }
  0x79   : > { %1494 = vmatprep.mubr.bf16.mxu0 %v791_v41  ;;  %1534 = vmatprep.mubr.bf16.mxu1 %v793_v42  ;;  %v344_v1 = vrot.slane %v241_v51, %v4200_v24  ;;  %v351_v2 = vrot.slane %v337_v54, %v4200_v24  ;;  %v3535_v3 = vcombine.high %v892_v55, %v940_v58  ;;  %v244_v42 = vld [vmem:[%s4171_s21 + $0x30] sm:$0xff]  ;;  %v947_v51 = vld [vmem:[%s4177_s12 + $0x1e8] sm:$0xff] }
  0x7a   : > { %1495 = vmatmul.mubr.bf16.vlgmr.msra.gmra.mrb[0].mxu0 %v790_v34  ;;  %1535 = vmatmul.mubr.bf16.vlgmr.msra.gmra.mrb[0].mxu1 %v792_v35  ;;  %v3537_v4 = vcombine.high %v893_v59, %v941_v60  ;;  %v354_v8 = vcombine.high %v242_v5, %v242_v5  ;;  %v798_v10 = vpack.c.bf16 %v327_v47, %v327_v47 }
  0x7b   : > { %1543 = vmatpush1.bf16.xpose.msra.mxu0 %v3526_v43  ;;  %1583 = vmatpush1.bf16.xpose.msra.mxu1 %v3528_v44  ;;  %v352_v6 = vcombine.high %v344_v1, %v344_v1  ;;  %v353_v7 = vcombine.high %v351_v2, %v351_v2  ;;  %v800_v11 = vpack.c.bf16 %v334_v48, %v334_v48 }
  0x7c   : > { %1574 = vmatprep.mubr.bf16.mxu0 %v795_v45  ;;  %1614 = vmatprep.mubr.bf16.mxu1 %v797_v46  ;;  %v3534_v15 = vcombine.low %v892_v55, %v940_v58  ;;  %v3536_v16 = vcombine.low %v893_v59, %v941_v60  ;;  %v361_v19 = vrot.slane %v242_v5, %v4200_v24  ;;  %v898_v46 = vld [vmem:[%s4177_s12 + $0x60] sm:$0xff]  ;;  %v245_v60 = vld [vmem:[%s4171_s21 + $0x38] sm:$0xff] }
  0x7d   : > { %1622 = vmatprep.subr.bf16.mxu0 %v3531_v49  ;;  %1662 = vmatprep.subr.bf16.mxu1 %v3533_v50  ;;  %v803_v17 = vpack.c.bf16 %v352_v6, %v352_v6  ;;  %v805_v18 = vpack.c.bf16 %v353_v7, %v353_v7  ;;  %v368_v20 = vrot.slane %v354_v8, %v4200_v24  ;;  %v946_v49 = vld [vmem:[%s4177_s12 + $0x1e0] sm:$0xff]  ;;  %v899_v50 = vld [vmem:[%s4177_s12 + $0x68] sm:$0xff]  ;;  %v949_v5 = vld [vmem:[%s4177_s12 + $0x1f8] sm:$0xff] }
  0x7e   : > { %v3539_v21 = vcombine.high %v894_v9, %v942_v12  ;;  %v3541_v22 = vcombine.high %v895_v13, %v943_v14  ;;  %v369_v25 = vcombine.high %v361_v19, %v361_v19  ;;  %v371_v27 = vcombine.high %v243_v23, %v243_v23 }
  0x7f   : > { %v370_v26 = vcombine.high %v368_v20, %v368_v20  ;;  %v802_v29 = vpack.c.bf16 %v344_v1, %v344_v1  ;;  %v804_v30 = vpack.c.bf16 %v351_v2, %v351_v2  ;;  %v3538_v34 = vcombine.low %v894_v9, %v942_v12 }
  0x80   : > { %v3540_v35 = vcombine.low %v895_v13, %v943_v14  ;;  %v807_v36 = vpack.c.bf16 %v369_v25, %v369_v25  ;;  %v378_v38 = vrot.slane %v243_v23, %v4200_v24  ;;  %v385_v39 = vrot.slane %v371_v27, %v4200_v24  ;;  %v246_v14 = vld [vmem:[%s4171_s21 + $0x40] sm:$0xff]  ;;  %v951_v23 = vld [vmem:[%s4177_s12 + $0x208] sm:$0xff] }
  0x81   : > { %v809_v37 = vpack.c.bf16 %v370_v26, %v370_v26  ;;  %v3543_v40 = vcombine.high %v896_v28, %v944_v31  ;;  %v3545_v41 = vcombine.high %v897_v32, %v945_v33  ;;  %v388_v45 = vcombine.high %v244_v42, %v244_v42 }
  0x82   : > { %1575 = vmatmul.mubr.bf16.vlgmr.msra.gmra.mrb[4].mxu0 %v794_v56  ;;  %1615 = vmatmul.mubr.bf16.vlgmr.msra.gmra.mrb[4].mxu1 %v796_v57  ;;  %v386_v43 = vcombine.high %v378_v38, %v378_v38  ;;  %v387_v44 = vcombine.high %v385_v39, %v385_v39  ;;  %v806_v47 = vpack.c.bf16 %v361_v19, %v361_v19 }
  0x83   : > { %1623 = vmatpush1.bf16.xpose.msra.mxu0 %v3530_v61  ;;  %1663 = vmatpush1.bf16.xpose.msra.mxu1 %v3532_v62  ;;  %v808_v48 = vpack.c.bf16 %v368_v20, %v368_v20  ;;  %v3542_v52 = vcombine.low %v896_v28, %v944_v31  ;;  %v3544_v53 = vcombine.low %v897_v32, %v945_v33  ;;  %v247_v33 = vld [vmem:[%s4171_s21 + $0x48] sm:$0xff] }
  0x84   : > { %1654 = vmatprep.mubr.bf16.mxu0 %v799_v63  ;;  %1694 = vmatprep.mubr.bf16.mxu1 %v801_v0  ;;  %v811_v54 = vpack.c.bf16 %v386_v43, %v386_v43  ;;  %v813_v55 = vpack.c.bf16 %v387_v44, %v387_v44  ;;  %v395_v56 = vrot.slane %v244_v42, %v4200_v24  ;;  %v900_v0 = vld [vmem:[%s4177_s12 + $0x70] sm:$0xff]  ;;  %v953_v42 = vld [vmem:[%s4177_s12 + $0x218] sm:$0xff] }
  0x85   : > { %1702 = vmatprep.subr.bf16.mxu0 %v3535_v3  ;;  %1742 = vmatprep.subr.bf16.mxu1 %v3537_v4  ;;  %v402_v57 = vrot.slane %v388_v45, %v4200_v24  ;;  %v3547_v58 = vcombine.high %v898_v46, %v946_v49  ;;  %v3549_v59 = vcombine.high %v899_v50, %v947_v51  ;;  %v948_v3 = vld [vmem:[%s4177_s12 + $0x1f0] sm:$0xff]  ;;  %v901_v4 = vld [vmem:[%s4177_s12 + $0x78] sm:$0xff] }
  0x86   : > { %v403_v61 = vcombine.high %v395_v56, %v395_v56  ;;  %v405_v63 = vcombine.high %v245_v60, %v245_v60  ;;  %v810_v1 = vpack.c.bf16 %v378_v38, %v378_v38  ;;  %v812_v2 = vpack.c.bf16 %v385_v39, %v385_v39 }
  0x87   : > { %v404_v62 = vcombine.high %v402_v57, %v402_v57  ;;  %v3546_v6 = vcombine.low %v898_v46, %v946_v49  ;;  %v3548_v7 = vcombine.low %v899_v50, %v947_v51  ;;  %v3551_v12 = vcombine.high %v900_v0, %v948_v3  ;;  %v248_v51 = vld [vmem:[%s4171_s21 + $0x50] sm:$0xff] }
  0x88   : > { %v815_v8 = vpack.c.bf16 %v403_v61, %v403_v61  ;;  %v3553_v13 = vcombine.high %v901_v4, %v949_v5  ;;  %v814_v19 = vpack.c.bf16 %v395_v56, %v395_v56  ;;  %v816_v20 = vpack.c.bf16 %v402_v57, %v402_v57 }
  0x89   : > { %v817_v9 = vpack.c.bf16 %v404_v62, %v404_v62  ;;  %v3550_v25 = vcombine.low %v900_v0, %v948_v3  ;;  %v3552_v26 = vcombine.low %v901_v4, %v949_v5  ;;  %v249_v5 = vld [vmem:[%s4171_s21 + $0x58] sm:$0xff] }
  0x8a   : > { %1655 = vmatmul.mubr.bf16.vlgmr.msra.gmra.mrb[8].mxu0 %v798_v10  ;;  %1695 = vmatmul.mubr.bf16.vlgmr.msra.gmra.mrb[8].mxu1 %v800_v11  ;;  %v412_v10 = vrot.slane %v245_v60, %v4200_v24  ;;  %v419_v11 = vrot.slane %v405_v63, %v4200_v24  ;;  %v955_v60 = vld [vmem:[%s4177_s12 + $0x228] sm:$0xff] }
  0x8b   : > { %1703 = vmatpush1.bf16.xpose.msra.mxu0 %v3534_v15  ;;  %1743 = vmatpush1.bf16.xpose.msra.mxu1 %v3536_v16 }
  0x8c   : > { %1734 = vmatprep.mubr.bf16.mxu0 %v803_v17  ;;  %1774 = vmatprep.mubr.bf16.mxu1 %v805_v18  ;;  %v420_v15 = vcombine.high %v412_v10, %v412_v10  ;;  %v421_v16 = vcombine.high %v419_v11, %v419_v11  ;;  %v422_v17 = vcombine.high %v246_v14, %v246_v14  ;;  %v902_v18 = vld [vmem:[%s4177_s12 + $0x80] sm:$0xff] }
  0x8d   : > { %1782 = vmatprep.subr.bf16.mxu0 %v3539_v21  ;;  %1822 = vmatprep.subr.bf16.mxu1 %v3541_v22  ;;  %v950_v21 = vld [vmem:[%s4177_s12 + $0x200] sm:$0xff]  ;;  %v903_v22 = vld [vmem:[%s4177_s12 + $0x88] sm:$0xff]  ;;  %v818_v38 = vpack.c.bf16 %v412_v10, %v412_v10  ;;  %v820_v39 = vpack.c.bf16 %v419_v11, %v419_v11 }
  0x8e   : > { %v819_v27 = vpack.c.bf16 %v420_v15, %v420_v15  ;;  %v821_v28 = vpack.c.bf16 %v421_v16, %v421_v16  ;;  %v3555_v31 = vcombine.high %v902_v18, %v950_v21  ;;  %v3557_v32 = vcombine.high %v903_v22, %v951_v23 }
  0x8f   : > { %v3554_v43 = vcombine.low %v902_v18, %v950_v21  ;;  %v3556_v44 = vcombine.low %v903_v22, %v951_v23  ;;  %v250_v23 = vld [vmem:[%s4171_s21 + $0x60] sm:$0xff] }
  0x92   : > { %1735 = vmatmul.mubr.bf16.vlgmr.msra.gmra.mrb[12].mxu0 %v802_v29  ;;  %1775 = vmatmul.mubr.bf16.vlgmr.msra.gmra.mrb[12].mxu1 %v804_v30  ;;  %v429_v29 = vrot.slane %v246_v14, %v4200_v24  ;;  %v436_v30 = vrot.slane %v422_v17, %v4200_v24  ;;  %v957_v14 = vld [vmem:[%s4177_s12 + $0x238] sm:$0xff] }
  0x93   : > { %1783 = vmatpush1.bf16.xpose.msra.mxu0 %v3538_v34  ;;  %1823 = vmatpush1.bf16.xpose.msra.mxu1 %v3540_v35 }
  0x94   : > { %1814 = vmatprep.mubr.bf16.mxu0 %v807_v36  ;;  %1854 = vmatprep.mubr.bf16.mxu1 %v809_v37  ;;  %v437_v34 = vcombine.high %v429_v29, %v429_v29  ;;  %v438_v35 = vcombine.high %v436_v30, %v436_v30  ;;  %v439_v36 = vcombine.high %v247_v33, %v247_v33  ;;  %v904_v37 = vld [vmem:[%s4177_s12 + $0x90] sm:$0xff] }
  0x95   : > { %1862 = vmatprep.subr.bf16.mxu0 %v3543_v40  ;;  %1902 = vmatprep.subr.bf16.mxu1 %v3545_v41  ;;  %v952_v40 = vld [vmem:[%s4177_s12 + $0x210] sm:$0xff]  ;;  %v905_v41 = vld [vmem:[%s4177_s12 + $0x98] sm:$0xff]  ;;  %v822_v56 = vpack.c.bf16 %v429_v29, %v429_v29  ;;  %v824_v57 = vpack.c.bf16 %v436_v30, %v436_v30 }
  0x96   : > { %v823_v45 = vpack.c.bf16 %v437_v34, %v437_v34  ;;  %v825_v46 = vpack.c.bf16 %v438_v35, %v438_v35  ;;  %v3559_v49 = vcombine.high %v904_v37, %v952_v40  ;;  %v3561_v50 = vcombine.high %v905_v41, %v953_v42 }
  0x97   : > { %v3558_v61 = vcombine.low %v904_v37, %v952_v40  ;;  %v3560_v62 = vcombine.low %v905_v41, %v953_v42  ;;  %v251_v42 = vld [vmem:[%s4171_s21 + $0x68] sm:$0xff] }
  0x9a   : > { %1815 = vmatmul.mubr.bf16.vlgmr.msra.gmra.mrb[16].mxu0 %v806_v47  ;;  %1855 = vmatmul.mubr.bf16.vlgmr.msra.gmra.mrb[16].mxu1 %v808_v48  ;;  %v446_v47 = vrot.slane %v247_v33, %v4200_v24  ;;  %v453_v48 = vrot.slane %v439_v36, %v4200_v24  ;;  %v959_v33 = vld [vmem:[%s4177_s12 + $0x248] sm:$0xff] }
  0x9b   : > { %1863 = vmatpush1.bf16.xpose.msra.mxu0 %v3542_v52  ;;  %1903 = vmatpush1.bf16.xpose.msra.mxu1 %v3544_v53 }
  0x9c   : > { %1894 = vmatprep.mubr.bf16.mxu0 %v811_v54  ;;  %1934 = vmatprep.mubr.bf16.mxu1 %v813_v55  ;;  %v454_v52 = vcombine.high %v446_v47, %v446_v47  ;;  %v455_v53 = vcombine.high %v453_v48, %v453_v48  ;;  %v456_v54 = vcombine.high %v248_v51, %v248_v51  ;;  %v906_v55 = vld [vmem:[%s4177_s12 + $0xa0] sm:$0xff] }
  0x9d   : > { %1942 = vmatprep.subr.bf16.mxu0 %v3547_v58  ;;  %1982 = vmatprep.subr.bf16.mxu1 %v3549_v59  ;;  %v954_v58 = vld [vmem:[%s4177_s12 + $0x220] sm:$0xff]  ;;  %v907_v59 = vld [vmem:[%s4177_s12 + $0xa8] sm:$0xff]  ;;  %v826_v10 = vpack.c.bf16 %v446_v47, %v446_v47  ;;  %v828_v11 = vpack.c.bf16 %v453_v48, %v453_v48 }
  0x9e   : > { %v827_v63 = vpack.c.bf16 %v454_v52, %v454_v52  ;;  %v829_v0 = vpack.c.bf16 %v455_v53, %v455_v53  ;;  %v3563_v3 = vcombine.high %v906_v55, %v954_v58  ;;  %v3565_v4 = vcombine.high %v907_v59, %v955_v60 }
  0x9f   : > { %v3562_v15 = vcombine.low %v906_v55, %v954_v58  ;;  %v3564_v16 = vcombine.low %v907_v59, %v955_v60  ;;  %v252_v60 = vld [vmem:[%s4171_s21 + $0x70] sm:$0xff] }
  0xa2   : > { %1895 = vmatmul.mubr.bf16.vlgmr.msra.gmra.mrb[20].mxu0 %v810_v1  ;;  %1935 = vmatmul.mubr.bf16.vlgmr.msra.gmra.mrb[20].mxu1 %v812_v2  ;;  %v463_v1 = vrot.slane %v248_v51, %v4200_v24  ;;  %v470_v2 = vrot.slane %v456_v54, %v4200_v24  ;;  %v961_v51 = vld [vmem:[%s4177_s12 + $0x258] sm:$0xff] }
  0xa3   : > { %1943 = vmatpush1.bf16.xpose.msra.mxu0 %v3546_v6  ;;  %1983 = vmatpush1.bf16.xpose.msra.mxu1 %v3548_v7 }
  0xa4   : > { %1974 = vmatprep.mubr.bf16.mxu0 %v815_v8  ;;  %2014 = vmatprep.mubr.bf16.mxu1 %v817_v9  ;;  %v471_v6 = vcombine.high %v463_v1, %v463_v1  ;;  %v472_v7 = vcombine.high %v470_v2, %v470_v2  ;;  %v473_v8 = vcombine.high %v249_v5, %v249_v5  ;;  %v908_v9 = vld [vmem:[%s4177_s12 + $0xb0] sm:$0xff] }
  0xa5   : > { %2022 = vmatprep.subr.bf16.mxu0 %v3551_v12  ;;  %2062 = vmatprep.subr.bf16.mxu1 %v3553_v13  ;;  %v956_v12 = vld [vmem:[%s4177_s12 + $0x230] sm:$0xff]  ;;  %v909_v13 = vld [vmem:[%s4177_s12 + $0xb8] sm:$0xff]  ;;  %v830_v29 = vpack.c.bf16 %v463_v1, %v463_v1  ;;  %v832_v30 = vpack.c.bf16 %v470_v2, %v470_v2 }
  0xa6   : > { %v831_v17 = vpack.c.bf16 %v471_v6, %v471_v6  ;;  %v833_v18 = vpack.c.bf16 %v472_v7, %v472_v7  ;;  %v3567_v21 = vcombine.high %v908_v9, %v956_v12  ;;  %v3569_v22 = vcombine.high %v909_v13, %v957_v14 }
  0xa7   : > { %v3566_v34 = vcombine.low %v908_v9, %v956_v12  ;;  %v3568_v35 = vcombine.low %v909_v13, %v957_v14  ;;  %v253_v14 = vld [vmem:[%s4171_s21 + $0x78] sm:$0xff] }
  0xaa   : > { %1975 = vmatmul.mubr.bf16.vlgmr.msra.gmra.mrb[24].mxu0 %v814_v19  ;;  %2015 = vmatmul.mubr.bf16.vlgmr.msra.gmra.mrb[24].mxu1 %v816_v20  ;;  %v480_v19 = vrot.slane %v249_v5, %v4200_v24  ;;  %v487_v20 = vrot.slane %v473_v8, %v4200_v24  ;;  %v963_v5 = vld [vmem:[%s4177_s12 + $0x268] sm:$0xff] }
  0xab   : > { %2023 = vmatpush1.bf16.xpose.msra.mxu0 %v3550_v25  ;;  %2063 = vmatpush1.bf16.xpose.msra.mxu1 %v3552_v26 }
  0xac   : > { %2054 = vmatprep.mubr.bf16.mxu0 %v819_v27  ;;  %2094 = vmatprep.mubr.bf16.mxu1 %v821_v28  ;;  %v488_v25 = vcombine.high %v480_v19, %v480_v19  ;;  %v489_v26 = vcombine.high %v487_v20, %v487_v20  ;;  %v490_v27 = vcombine.high %v250_v23, %v250_v23  ;;  %v910_v28 = vld [vmem:[%s4177_s12 + $0xc0] sm:$0xff] }
  0xad   : > { %2102 = vmatprep.subr.bf16.mxu0 %v3555_v31  ;;  %2142 = vmatprep.subr.bf16.mxu1 %v3557_v32  ;;  %v958_v31 = vld [vmem:[%s4177_s12 + $0x240] sm:$0xff]  ;;  %v911_v32 = vld [vmem:[%s4177_s12 + $0xc8] sm:$0xff]  ;;  %v834_v47 = vpack.c.bf16 %v480_v19, %v480_v19  ;;  %v836_v48 = vpack.c.bf16 %v487_v20, %v487_v20 }
  0xae   : > { %v835_v36 = vpack.c.bf16 %v488_v25, %v488_v25  ;;  %v837_v37 = vpack.c.bf16 %v489_v26, %v489_v26  ;;  %v3571_v40 = vcombine.high %v910_v28, %v958_v31  ;;  %v3573_v41 = vcombine.high %v911_v32, %v959_v33 }
  0xaf   : > { %v3570_v52 = vcombine.low %v910_v28, %v958_v31  ;;  %v3572_v53 = vcombine.low %v911_v32, %v959_v33  ;;  %v254_v33 = vld [vmem:[%s4171_s21 + $0x80] sm:$0xff] }
  0xb2   : > { %2055 = vmatmul.mubr.bf16.vlgmr.msra.gmra.mrb[28].mxu0 %v818_v38  ;;  %2095 = vmatmul.mubr.bf16.vlgmr.msra.gmra.mrb[28].mxu1 %v820_v39  ;;  %v497_v38 = vrot.slane %v250_v23, %v4200_v24  ;;  %v504_v39 = vrot.slane %v490_v27, %v4200_v24  ;;  %v965_v23 = vld [vmem:[%s4177_s12 + $0x278] sm:$0xff] }
  0xb3   : > { %2103 = vmatpush1.bf16.xpose.msra.mxu0 %v3554_v43  ;;  %2143 = vmatpush1.bf16.xpose.msra.mxu1 %v3556_v44 }
  0xb4   : > { %2134 = vmatprep.mubr.bf16.mxu0 %v823_v45  ;;  %2174 = vmatprep.mubr.bf16.mxu1 %v825_v46  ;;  %v505_v43 = vcombine.high %v497_v38, %v497_v38  ;;  %v506_v44 = vcombine.high %v504_v39, %v504_v39  ;;  %v507_v45 = vcombine.high %v251_v42, %v251_v42  ;;  %v912_v46 = vld [vmem:[%s4177_s12 + $0xd0] sm:$0xff] }
  0xb5   : > { %2182 = vmatprep.subr.bf16.mxu0 %v3559_v49  ;;  %2222 = vmatprep.subr.bf16.mxu1 %v3561_v50  ;;  %v960_v49 = vld [vmem:[%s4177_s12 + $0x250] sm:$0xff]  ;;  %v913_v50 = vld [vmem:[%s4177_s12 + $0xd8] sm:$0xff]  ;;  %v838_v1 = vpack.c.bf16 %v497_v38, %v497_v38  ;;  %v840_v2 = vpack.c.bf16 %v504_v39, %v504_v39 }
  0xb6   : > { %v839_v54 = vpack.c.bf16 %v505_v43, %v505_v43  ;;  %v841_v55 = vpack.c.bf16 %v506_v44, %v506_v44  ;;  %v3575_v58 = vcombine.high %v912_v46, %v960_v49  ;;  %v3577_v59 = vcombine.high %v913_v50, %v961_v51 }
  0xb7   : > { %v3574_v6 = vcombine.low %v912_v46, %v960_v49  ;;  %v3576_v7 = vcombine.low %v913_v50, %v961_v51  ;;  %v255_v51 = vld [vmem:[%s4171_s21 + $0x88] sm:$0xff] }
  0xba   : > { %2135 = vmatmul.mubr.bf16.vlgmr.msra.gmra.mrb[32].mxu0 %v822_v56  ;;  %2175 = vmatmul.mubr.bf16.vlgmr.msra.gmra.mrb[32].mxu1 %v824_v57  ;;  %v514_v56 = vrot.slane %v251_v42, %v4200_v24  ;;  %v521_v57 = vrot.slane %v507_v45, %v4200_v24  ;;  %v967_v42 = vld [vmem:[%s4177_s12 + $0x288] sm:$0xff] }
  0xbb   : > { %2183 = vmatpush1.bf16.xpose.msra.mxu0 %v3558_v61  ;;  %2223 = vmatpush1.bf16.xpose.msra.mxu1 %v3560_v62 }
  0xbc   : > { %2214 = vmatprep.mubr.bf16.mxu0 %v827_v63  ;;  %2254 = vmatprep.mubr.bf16.mxu1 %v829_v0  ;;  %v522_v61 = vcombine.high %v514_v56, %v514_v56  ;;  %v523_v62 = vcombine.high %v521_v57, %v521_v57  ;;  %v524_v63 = vcombine.high %v252_v60, %v252_v60  ;;  %v914_v0 = vld [vmem:[%s4177_s12 + $0xe0] sm:$0xff] }
  0xbd   : > { %2262 = vmatprep.subr.bf16.mxu0 %v3563_v3  ;;  %2302 = vmatprep.subr.bf16.mxu1 %v3565_v4  ;;  %v962_v3 = vld [vmem:[%s4177_s12 + $0x260] sm:$0xff]  ;;  %v915_v4 = vld [vmem:[%s4177_s12 + $0xe8] sm:$0xff]  ;;  %v842_v19 = vpack.c.bf16 %v514_v56, %v514_v56  ;;  %v844_v20 = vpack.c.bf16 %v521_v57, %v521_v57 }
  0xbe   : > { %v843_v8 = vpack.c.bf16 %v522_v61, %v522_v61  ;;  %v845_v9 = vpack.c.bf16 %v523_v62, %v523_v62  ;;  %v3579_v12 = vcombine.high %v914_v0, %v962_v3  ;;  %v3581_v13 = vcombine.high %v915_v4, %v963_v5 }
  0xbf   : > { %v3578_v25 = vcombine.low %v914_v0, %v962_v3  ;;  %v3580_v26 = vcombine.low %v915_v4, %v963_v5  ;;  %v256_v5 = vld [vmem:[%s4171_s21 + $0x90] sm:$0xff] }
  0xc2   : > { %2215 = vmatmul.mubr.bf16.vlgmr.msra.gmra.mrb[36].mxu0 %v826_v10  ;;  %2255 = vmatmul.mubr.bf16.vlgmr.msra.gmra.mrb[36].mxu1 %v828_v11  ;;  %v531_v10 = vrot.slane %v252_v60, %v4200_v24  ;;  %v538_v11 = vrot.slane %v524_v63, %v4200_v24  ;;  %v969_v60 = vld [vmem:[%s4177_s12 + $0x298] sm:$0xff] }
  0xc3   : > { %2263 = vmatpush1.bf16.xpose.msra.mxu0 %v3562_v15  ;;  %2303 = vmatpush1.bf16.xpose.msra.mxu1 %v3564_v16 }
  0xc4   : > { %2294 = vmatprep.mubr.bf16.mxu0 %v831_v17  ;;  %2334 = vmatprep.mubr.bf16.mxu1 %v833_v18  ;;  %v539_v15 = vcombine.high %v531_v10, %v531_v10  ;;  %v540_v16 = vcombine.high %v538_v11, %v538_v11  ;;  %v541_v17 = vcombine.high %v253_v14, %v253_v14  ;;  %v916_v18 = vld [vmem:[%s4177_s12 + $0xf0] sm:$0xff] }
  0xc5   : > { %2342 = vmatprep.subr.bf16.mxu0 %v3567_v21  ;;  %2382 = vmatprep.subr.bf16.mxu1 %v3569_v22  ;;  %v964_v21 = vld [vmem:[%s4177_s12 + $0x270] sm:$0xff]  ;;  %v917_v22 = vld [vmem:[%s4177_s12 + $0xf8] sm:$0xff]  ;;  %v846_v38 = vpack.c.bf16 %v531_v10, %v531_v10  ;;  %v848_v39 = vpack.c.bf16 %v538_v11, %v538_v11 }
  0xc6   : > { %v847_v27 = vpack.c.bf16 %v539_v15, %v539_v15  ;;  %v849_v28 = vpack.c.bf16 %v540_v16, %v540_v16  ;;  %v3583_v31 = vcombine.high %v916_v18, %v964_v21  ;;  %v3585_v32 = vcombine.high %v917_v22, %v965_v23 }
  0xc7   : > { %v3582_v43 = vcombine.low %v916_v18, %v964_v21  ;;  %v3584_v44 = vcombine.low %v917_v22, %v965_v23  ;;  %v257_v23 = vld [vmem:[%s4171_s21 + $0x98] sm:$0xff] }
  0xca   : > { %2295 = vmatmul.mubr.bf16.vlgmr.msra.gmra.mrb[40].mxu0 %v830_v29  ;;  %2335 = vmatmul.mubr.bf16.vlgmr.msra.gmra.mrb[40].mxu1 %v832_v30  ;;  %v548_v29 = vrot.slane %v253_v14, %v4200_v24  ;;  %v555_v30 = vrot.slane %v541_v17, %v4200_v24  ;;  %v971_v14 = vld [vmem:[%s4177_s12 + $0x2a8] sm:$0xff] }
  0xcb   : > { %2343 = vmatpush1.bf16.xpose.msra.mxu0 %v3566_v34  ;;  %2383 = vmatpush1.bf16.xpose.msra.mxu1 %v3568_v35 }
  0xcc   : > { %2374 = vmatprep.mubr.bf16.mxu0 %v835_v36  ;;  %2414 = vmatprep.mubr.bf16.mxu1 %v837_v37  ;;  %v556_v34 = vcombine.high %v548_v29, %v548_v29  ;;  %v557_v35 = vcombine.high %v555_v30, %v555_v30  ;;  %v558_v36 = vcombine.high %v254_v33, %v254_v33  ;;  %v918_v37 = vld [vmem:[%s4177_s12 + $0x100] sm:$0xff] }
  0xcd   : > { %2422 = vmatprep.subr.bf16.mxu0 %v3571_v40  ;;  %2462 = vmatprep.subr.bf16.mxu1 %v3573_v41  ;;  %v966_v40 = vld [vmem:[%s4177_s12 + $0x280] sm:$0xff]  ;;  %v919_v41 = vld [vmem:[%s4177_s12 + $0x108] sm:$0xff]  ;;  %v850_v56 = vpack.c.bf16 %v548_v29, %v548_v29  ;;  %v852_v57 = vpack.c.bf16 %v555_v30, %v555_v30 }
  0xce   : > { %v851_v45 = vpack.c.bf16 %v556_v34, %v556_v34  ;;  %v853_v46 = vpack.c.bf16 %v557_v35, %v557_v35  ;;  %v3587_v49 = vcombine.high %v918_v37, %v966_v40  ;;  %v3589_v50 = vcombine.high %v919_v41, %v967_v42 }
  0xcf   : > { %v3586_v61 = vcombine.low %v918_v37, %v966_v40  ;;  %v3588_v62 = vcombine.low %v919_v41, %v967_v42  ;;  %v258_v42 = vld [vmem:[%s4171_s21 + $0xa0] sm:$0xff] }
  0xd2   : > { %2375 = vmatmul.mubr.bf16.vlgmr.msra.gmra.mrb[44].mxu0 %v834_v47  ;;  %2415 = vmatmul.mubr.bf16.vlgmr.msra.gmra.mrb[44].mxu1 %v836_v48  ;;  %v565_v47 = vrot.slane %v254_v33, %v4200_v24  ;;  %v572_v48 = vrot.slane %v558_v36, %v4200_v24  ;;  %v973_v33 = vld [vmem:[%s4177_s12 + $0x2b8] sm:$0xff] }
  0xd3   : > { %2423 = vmatpush1.bf16.xpose.msra.mxu0 %v3570_v52  ;;  %2463 = vmatpush1.bf16.xpose.msra.mxu1 %v3572_v53 }
  0xd4   : > { %2454 = vmatprep.mubr.bf16.mxu0 %v839_v54  ;;  %2494 = vmatprep.mubr.bf16.mxu1 %v841_v55  ;;  %v573_v52 = vcombine.high %v565_v47, %v565_v47  ;;  %v574_v53 = vcombine.high %v572_v48, %v572_v48  ;;  %v575_v54 = vcombine.high %v255_v51, %v255_v51  ;;  %v920_v55 = vld [vmem:[%s4177_s12 + $0x110] sm:$0xff] }
  0xd5   : > { %2502 = vmatprep.subr.bf16.mxu0 %v3575_v58  ;;  %2542 = vmatprep.subr.bf16.mxu1 %v3577_v59  ;;  %v968_v58 = vld [vmem:[%s4177_s12 + $0x290] sm:$0xff]  ;;  %v921_v59 = vld [vmem:[%s4177_s12 + $0x118] sm:$0xff]  ;;  %v854_v10 = vpack.c.bf16 %v565_v47, %v565_v47  ;;  %v856_v11 = vpack.c.bf16 %v572_v48, %v572_v48 }
  0xd6   : > { %v855_v63 = vpack.c.bf16 %v573_v52, %v573_v52  ;;  %v857_v0 = vpack.c.bf16 %v574_v53, %v574_v53  ;;  %v3591_v3 = vcombine.high %v920_v55, %v968_v58  ;;  %v3593_v4 = vcombine.high %v921_v59, %v969_v60 }
  0xd7   : > { %v3590_v15 = vcombine.low %v920_v55, %v968_v58  ;;  %v3592_v16 = vcombine.low %v921_v59, %v969_v60  ;;  %v259_v60 = vld [vmem:[%s4171_s21 + $0xa8] sm:$0xff] }
  0xda   : > { %2455 = vmatmul.mubr.bf16.vlgmr.msra.gmra.mrb[48].mxu0 %v838_v1  ;;  %2495 = vmatmul.mubr.bf16.vlgmr.msra.gmra.mrb[48].mxu1 %v840_v2  ;;  %v582_v1 = vrot.slane %v255_v51, %v4200_v24  ;;  %v589_v2 = vrot.slane %v575_v54, %v4200_v24  ;;  %v975_v51 = vld [vmem:[%s4177_s12 + $0x2c8] sm:$0xff] }
  0xdb   : > { %2503 = vmatpush1.bf16.xpose.msra.mxu0 %v3574_v6  ;;  %2543 = vmatpush1.bf16.xpose.msra.mxu1 %v3576_v7 }
  0xdc   : > { %2534 = vmatprep.mubr.bf16.mxu0 %v843_v8  ;;  %2574 = vmatprep.mubr.bf16.mxu1 %v845_v9  ;;  %v590_v6 = vcombine.high %v582_v1, %v582_v1  ;;  %v591_v7 = vcombine.high %v589_v2, %v589_v2  ;;  %v592_v8 = vcombine.high %v256_v5, %v256_v5  ;;  %v922_v9 = vld [vmem:[%s4177_s12 + $0x120] sm:$0xff] }
  0xdd   : > { %2582 = vmatprep.subr.bf16.mxu0 %v3579_v12  ;;  %2622 = vmatprep.subr.bf16.mxu1 %v3581_v13  ;;  %v970_v12 = vld [vmem:[%s4177_s12 + $0x2a0] sm:$0xff]  ;;  %v923_v13 = vld [vmem:[%s4177_s12 + $0x128] sm:$0xff]  ;;  %v858_v29 = vpack.c.bf16 %v582_v1, %v582_v1  ;;  %v860_v30 = vpack.c.bf16 %v589_v2, %v589_v2 }
  0xde   : > { %v859_v17 = vpack.c.bf16 %v590_v6, %v590_v6  ;;  %v861_v18 = vpack.c.bf16 %v591_v7, %v591_v7  ;;  %v3595_v21 = vcombine.high %v922_v9, %v970_v12  ;;  %v3597_v22 = vcombine.high %v923_v13, %v971_v14 }
  0xdf   : > { %v3594_v34 = vcombine.low %v922_v9, %v970_v12  ;;  %v3596_v35 = vcombine.low %v923_v13, %v971_v14  ;;  %v260_v14 = vld [vmem:[%s4171_s21 + $0xb0] sm:$0xff] }
  0xe2   : > { %2535 = vmatmul.mubr.bf16.vlgmr.msra.gmra.mrb[52].mxu0 %v842_v19  ;;  %2575 = vmatmul.mubr.bf16.vlgmr.msra.gmra.mrb[52].mxu1 %v844_v20  ;;  %v599_v19 = vrot.slane %v256_v5, %v4200_v24  ;;  %v606_v20 = vrot.slane %v592_v8, %v4200_v24  ;;  %v977_v5 = vld [vmem:[%s4177_s12 + $0x2d8] sm:$0xff] }
  0xe3   : > { %2583 = vmatpush1.bf16.xpose.msra.mxu0 %v3578_v25  ;;  %2623 = vmatpush1.bf16.xpose.msra.mxu1 %v3580_v26 }
  0xe4   : > { %2614 = vmatprep.mubr.bf16.mxu0 %v847_v27  ;;  %2654 = vmatprep.mubr.bf16.mxu1 %v849_v28  ;;  %v607_v25 = vcombine.high %v599_v19, %v599_v19  ;;  %v608_v26 = vcombine.high %v606_v20, %v606_v20  ;;  %v609_v27 = vcombine.high %v257_v23, %v257_v23  ;;  %v924_v28 = vld [vmem:[%s4177_s12 + $0x130] sm:$0xff] }
  0xe5   : > { %2662 = vmatprep.subr.bf16.mxu0 %v3583_v31  ;;  %2702 = vmatprep.subr.bf16.mxu1 %v3585_v32  ;;  %v972_v31 = vld [vmem:[%s4177_s12 + $0x2b0] sm:$0xff]  ;;  %v925_v32 = vld [vmem:[%s4177_s12 + $0x138] sm:$0xff]  ;;  %v862_v47 = vpack.c.bf16 %v599_v19, %v599_v19  ;;  %v864_v48 = vpack.c.bf16 %v606_v20, %v606_v20 }
  0xe6   : > { %v863_v36 = vpack.c.bf16 %v607_v25, %v607_v25  ;;  %v865_v37 = vpack.c.bf16 %v608_v26, %v608_v26  ;;  %v3599_v40 = vcombine.high %v924_v28, %v972_v31  ;;  %v3601_v41 = vcombine.high %v925_v32, %v973_v33 }
  0xe7   : > { %v3598_v52 = vcombine.low %v924_v28, %v972_v31  ;;  %v3600_v53 = vcombine.low %v925_v32, %v973_v33  ;;  %v261_v33 = vld [vmem:[%s4171_s21 + $0xb8] sm:$0xff] }
  0xea   : > { %2615 = vmatmul.mubr.bf16.vlgmr.msra.gmra.mrb[56].mxu0 %v846_v38  ;;  %2655 = vmatmul.mubr.bf16.vlgmr.msra.gmra.mrb[56].mxu1 %v848_v39  ;;  %v616_v38 = vrot.slane %v257_v23, %v4200_v24  ;;  %v623_v39 = vrot.slane %v609_v27, %v4200_v24  ;;  %v979_v23 = vld [vmem:[%s4177_s12 + $0x2e8] sm:$0xff] }
  0xeb   : > { %2663 = vmatpush1.bf16.xpose.msra.mxu0 %v3582_v43  ;;  %2703 = vmatpush1.bf16.xpose.msra.mxu1 %v3584_v44 }
  0xec   : > { %2694 = vmatprep.mubr.bf16.mxu0 %v851_v45  ;;  %2734 = vmatprep.mubr.bf16.mxu1 %v853_v46  ;;  %v624_v43 = vcombine.high %v616_v38, %v616_v38  ;;  %v625_v44 = vcombine.high %v623_v39, %v623_v39  ;;  %v626_v45 = vcombine.high %v258_v42, %v258_v42  ;;  %v926_v46 = vld [vmem:[%s4177_s12 + $0x140] sm:$0xff] }
  0xed   : > { %2742 = vmatprep.subr.bf16.mxu0 %v3587_v49  ;;  %2782 = vmatprep.subr.bf16.mxu1 %v3589_v50  ;;  %v974_v49 = vld [vmem:[%s4177_s12 + $0x2c0] sm:$0xff]  ;;  %v927_v50 = vld [vmem:[%s4177_s12 + $0x148] sm:$0xff]  ;;  %v866_v1 = vpack.c.bf16 %v616_v38, %v616_v38  ;;  %v868_v2 = vpack.c.bf16 %v623_v39, %v623_v39 }
  0xee   : > { %v867_v54 = vpack.c.bf16 %v624_v43, %v624_v43  ;;  %v869_v55 = vpack.c.bf16 %v625_v44, %v625_v44  ;;  %v3603_v58 = vcombine.high %v926_v46, %v974_v49  ;;  %v3605_v59 = vcombine.high %v927_v50, %v975_v51 }
  0xef   : > { %v3602_v6 = vcombine.low %v926_v46, %v974_v49  ;;  %v3604_v7 = vcombine.low %v927_v50, %v975_v51 }
  0xf2   : > { %2695 = vmatmul.mubr.bf16.vlgmr.msra.gmra.mrb[60].mxu0 %v850_v56  ;;  %2735 = vmatmul.mubr.bf16.vlgmr.msra.gmra.mrb[60].mxu1 %v852_v57  ;;  %v633_v56 = vrot.slane %v258_v42, %v4200_v24  ;;  %v640_v57 = vrot.slane %v626_v45, %v4200_v24  ;;  %v981_v42 = vld [vmem:[%s4177_s12 + $0x2f8] sm:$0xff] }
  0xf3   : > { %2743 = vmatpush1.bf16.xpose.msra.mxu0 %v3586_v61  ;;  %2783 = vmatpush1.bf16.xpose.msra.mxu1 %v3588_v62 }
  0xf4   : > { %2774 = vmatprep.mubr.bf16.mxu0 %v855_v63  ;;  %2814 = vmatprep.mubr.bf16.mxu1 %v857_v0  ;;  %v641_v61 = vcombine.high %v633_v56, %v633_v56  ;;  %v642_v62 = vcombine.high %v640_v57, %v640_v57  ;;  %v643_v63 = vcombine.high %v259_v60, %v259_v60  ;;  %v928_v0 = vld [vmem:[%s4177_s12 + $0x150] sm:$0xff] }
  0xf5   : > { %2822 = vmatprep.subr.bf16.mxu0 %v3591_v3  ;;  %2862 = vmatprep.subr.bf16.mxu1 %v3593_v4  ;;  %v976_v3 = vld [vmem:[%s4177_s12 + $0x2d0] sm:$0xff]  ;;  %v929_v4 = vld [vmem:[%s4177_s12 + $0x158] sm:$0xff]  ;;  %v870_v19 = vpack.c.bf16 %v633_v56, %v633_v56  ;;  %v872_v20 = vpack.c.bf16 %v640_v57, %v640_v57 }
  0xf6   : > { %v871_v8 = vpack.c.bf16 %v641_v61, %v641_v61  ;;  %v873_v9 = vpack.c.bf16 %v642_v62, %v642_v62  ;;  %v3607_v12 = vcombine.high %v928_v0, %v976_v3  ;;  %v3609_v13 = vcombine.high %v929_v4, %v977_v5 }
  0xf7   : > { %v3606_v25 = vcombine.low %v928_v0, %v976_v3  ;;  %v3608_v26 = vcombine.low %v929_v4, %v977_v5 }
  0xfa   : > { %2775 = vmatmul.mubr.bf16.vlgmr.msra.gmra.mrb[64].mxu0 %v854_v10  ;;  %2815 = vmatmul.mubr.bf16.vlgmr.msra.gmra.mrb[64].mxu1 %v856_v11  ;;  %v650_v10 = vrot.slane %v259_v60, %v4200_v24  ;;  %v657_v11 = vrot.slane %v643_v63, %v4200_v24 }
  0xfb   : > { %2823 = vmatpush1.bf16.xpose.msra.mxu0 %v3590_v15  ;;  %2863 = vmatpush1.bf16.xpose.msra.mxu1 %v3592_v16 }
  0xfc   : > { %2854 = vmatprep.mubr.bf16.mxu0 %v859_v17  ;;  %2894 = vmatprep.mubr.bf16.mxu1 %v861_v18  ;;  %v658_v15 = vcombine.high %v650_v10, %v650_v10  ;;  %v659_v16 = vcombine.high %v657_v11, %v657_v11  ;;  %v660_v17 = vcombine.high %v260_v14, %v260_v14  ;;  %v930_v18 = vld [vmem:[%s4177_s12 + $0x160] sm:$0xff] }
  0xfd   : > { %2902 = vmatprep.subr.bf16.mxu0 %v3595_v21  ;;  %2942 = vmatprep.subr.bf16.mxu1 %v3597_v22  ;;  %v978_v21 = vld [vmem:[%s4177_s12 + $0x2e0] sm:$0xff]  ;;  %v931_v22 = vld [vmem:[%s4177_s12 + $0x168] sm:$0xff]  ;;  %v874_v38 = vpack.c.bf16 %v650_v10, %v650_v10  ;;  %v876_v39 = vpack.c.bf16 %v657_v11, %v657_v11 }
  0xfe   : > { %v875_v27 = vpack.c.bf16 %v658_v15, %v658_v15  ;;  %v877_v28 = vpack.c.bf16 %v659_v16, %v659_v16  ;;  %v3611_v31 = vcombine.high %v930_v18, %v978_v21  ;;  %v3613_v32 = vcombine.high %v931_v22, %v979_v23 }
  0xff   : > { %v3610_v43 = vcombine.low %v930_v18, %v978_v21  ;;  %v3612_v44 = vcombine.low %v931_v22, %v979_v23 }
 0x102   : > { %2855 = vmatmul.mubr.bf16.vlgmr.msra.gmra.mrb[68].mxu0 %v858_v29  ;;  %2895 = vmatmul.mubr.bf16.vlgmr.msra.gmra.mrb[68].mxu1 %v860_v30  ;;  %v667_v29 = vrot.slane %v260_v14, %v4200_v24  ;;  %v674_v30 = vrot.slane %v660_v17, %v4200_v24 }
 0x103   : > { %2903 = vmatpush1.bf16.xpose.msra.mxu0 %v3594_v34  ;;  %2943 = vmatpush1.bf16.xpose.msra.mxu1 %v3596_v35 }
 0x104   : > { %2934 = vmatprep.mubr.bf16.mxu0 %v863_v36  ;;  %2974 = vmatprep.mubr.bf16.mxu1 %v865_v37  ;;  %v675_v34 = vcombine.high %v667_v29, %v667_v29  ;;  %v676_v35 = vcombine.high %v674_v30, %v674_v30  ;;  %v677_v36 = vcombine.high %v261_v33, %v261_v33  ;;  %v932_v37 = vld [vmem:[%s4177_s12 + $0x170] sm:$0xff] }
 0x105   : > { %2982 = vmatprep.subr.bf16.mxu0 %v3599_v40  ;;  %3022 = vmatprep.subr.bf16.mxu1 %v3601_v41  ;;  %v980_v40 = vld [vmem:[%s4177_s12 + $0x2f0] sm:$0xff]  ;;  %v933_v41 = vld [vmem:[%s4177_s12 + $0x178] sm:$0xff] }
 0x106   : > { %v879_v45 = vpack.c.bf16 %v675_v34, %v675_v34  ;;  %v881_v46 = vpack.c.bf16 %v676_v35, %v676_v35  ;;  %v3615_v49 = vcombine.high %v932_v37, %v980_v40  ;;  %v3617_v50 = vcombine.high %v933_v41, %v981_v42 }
 0x107   : > { %v3616_v56 = vcombine.low %v933_v41, %v981_v42 }
 0x10a   : > { %2935 = vmatmul.mubr.bf16.vlgmr.msra.gmra.mrb[72].mxu0 %v862_v47  ;;  %2975 = vmatmul.mubr.bf16.vlgmr.msra.gmra.mrb[72].mxu1 %v864_v48  ;;  %v684_v47 = vrot.slane %v261_v33, %v4200_v24  ;;  %v691_v48 = vrot.slane %v677_v36, %v4200_v24 }
 0x10b   : > { %2983 = vmatpush1.bf16.xpose.msra.mxu0 %v3598_v52  ;;  %3023 = vmatpush1.bf16.xpose.msra.mxu1 %v3600_v53  ;;  %v878_v53 = vpack.c.bf16 %v667_v29, %v667_v29 }
 0x10c   : > { %3014 = vmatprep.mubr.bf16.mxu0 %v867_v54  ;;  %3054 = vmatprep.mubr.bf16.mxu1 %v869_v55  ;;  %v692_v51 = vcombine.high %v684_v47, %v684_v47  ;;  %v693_v52 = vcombine.high %v691_v48, %v691_v48  ;;  %v880_v54 = vpack.c.bf16 %v674_v30, %v674_v30 }
 0x10d   : > { %3062 = vmatprep.subr.bf16.mxu0 %v3603_v58  ;;  %3102 = vmatprep.subr.bf16.mxu1 %v3605_v59  ;;  %v3614_v55 = vcombine.low %v932_v37, %v980_v40  ;;  %v882_v24 = vpack.c.bf16 %v684_v47, %v684_v47  ;;  %v884_v59 = vpack.c.bf16 %v691_v48, %v691_v48 }
 0x10e   : > { %v883_v57 = vpack.c.bf16 %v692_v51, %v692_v51  ;;  %v885_v58 = vpack.c.bf16 %v693_v52, %v693_v52 }
 0x112   : > { %3015 = vmatmul.mubr.bf16.vlgmr.msra.gmra.mrb[76].mxu0 %v866_v1  ;;  %3055 = vmatmul.mubr.bf16.vlgmr.msra.gmra.mrb[76].mxu1 %v868_v2 }
 0x113   : > { %3063 = vmatpush1.bf16.xpose.msra.mxu0 %v3602_v6  ;;  %3103 = vmatpush1.bf16.xpose.msra.mxu1 %v3604_v7 }
 0x114   : > { %3094 = vmatprep.mubr.bf16.mxu0 %v871_v8  ;;  %3134 = vmatprep.mubr.bf16.mxu1 %v873_v9 }
 0x115   : > { %3142 = vmatprep.subr.bf16.mxu0 %v3607_v12  ;;  %3182 = vmatprep.subr.bf16.mxu1 %v3609_v13 }
 0x11a   : > { %3095 = vmatmul.mubr.bf16.vlgmr.msra.gmra.mrb[80].mxu0 %v870_v19  ;;  %3135 = vmatmul.mubr.bf16.vlgmr.msra.gmra.mrb[80].mxu1 %v872_v20 }
 0x11b   : > { %3143 = vmatpush1.bf16.xpose.msra.mxu0 %v3606_v25  ;;  %3183 = vmatpush1.bf16.xpose.msra.mxu1 %v3608_v26 }
 0x11c   : > { %3174 = vmatprep.mubr.bf16.mxu0 %v875_v27  ;;  %3214 = vmatprep.mubr.bf16.mxu1 %v877_v28 }
 0x11d   : > { %3222 = vmatprep.subr.bf16.mxu0 %v3611_v31  ;;  %3262 = vmatprep.subr.bf16.mxu1 %v3613_v32 }
 0x122   : > { %3175 = vmatmul.mubr.bf16.vlgmr.msra.gmra.mrb[84].mxu0 %v874_v38  ;;  %3215 = vmatmul.mubr.bf16.vlgmr.msra.gmra.mrb[84].mxu1 %v876_v39 }
 0x123   : > { %3223 = vmatpush1.bf16.xpose.msra.mxu0 %v3610_v43  ;;  %3263 = vmatpush1.bf16.xpose.msra.mxu1 %v3612_v44 }
 0x124   : > { %3254 = vmatprep.mubr.bf16.mxu0 %v879_v45  ;;  %3294 = vmatprep.mubr.bf16.mxu1 %v881_v46 }
 0x125   : > { %3302 = vmatprep.subr.bf16.mxu0 %v3615_v49  ;;  %3342 = vmatprep.subr.bf16.mxu1 %v3617_v50 }
 0x12a   : > { %3255 = vmatmul.mubr.bf16.vlgmr.msra.gmra.mrb[88].mxu0 %v878_v53  ;;  %3295 = vmatmul.mubr.bf16.vlgmr.msra.gmra.mrb[88].mxu1 %v880_v54 }
 0x12b   : > { %3303 = vmatpush1.bf16.xpose.msra.mxu0 %v3614_v55  ;;  %3343 = vmatpush1.bf16.xpose.msra.mxu1 %v3616_v56 }
 0x12c   : > { %3334 = vmatprep.mubr.bf16.mxu0 %v883_v57  ;;  %3374 = vmatprep.mubr.bf16.mxu1 %v885_v58 }
 0x132   : > { %3335 = vmatmul.mubr.bf16.vlgmr.msra.gmra.mrb[92].mxu0 %v882_v24  ;;  %3375 = vmatmul.mubr.bf16.vlgmr.msra.gmra.mrb[92].mxu1 %v884_v59 }
 0x14d   : > { %v1496_v60 = vpop.f32.mrb[0].mxu0  ;;  %v1536_v61 = vpop.f32.mrb[0].mxu1 }
 0x14e   : > { %v1537_v62 = vadd.f32 %v1536_v61, %v1496_v60  ;;  %v1498_v63 = vpop.f32.mrb[1].mxu0  ;;  %v1538_v0 = vpop.f32.mrb[1].mxu1 }
 0x14f   : > { %v1499_v1 = vpop.f32.mrb[2].mxu0  ;;  %v1539_v2 = vpop.f32.mrb[2].mxu1 }
 0x150   : > { %v1500_v3 = vpop.f32.mrb[3].mxu0  ;;  %v1540_v4 = vpop.f32.mrb[3].mxu1 }
 0x155   : > { %v1576_v5 = vpop.f32.mrb[4].mxu0  ;;  %v1616_v6 = vpop.f32.mrb[4].mxu1 }
 0x156   : > { %v1577_v7 = vadd.f32 %v1576_v5, %v1537_v62  ;;  %v1578_v8 = vpop.f32.mrb[5].mxu0  ;;  %v1618_v9 = vpop.f32.mrb[5].mxu1 }
 0x157   : > { %v1579_v10 = vpop.f32.mrb[6].mxu0  ;;  %v1619_v11 = vpop.f32.mrb[6].mxu1 }
 0x158   : > { %v1617_v12 = vadd.f32 %v1616_v6, %v1577_v7  ;;  %v1580_v13 = vpop.f32.mrb[7].mxu0  ;;  %v1620_v14 = vpop.f32.mrb[7].mxu1 }
 0x15d   : > { %v1656_v15 = vpop.f32.mrb[8].mxu0  ;;  %v1696_v16 = vpop.f32.mrb[8].mxu1 }
 0x15e   : > { %v1657_v17 = vadd.f32 %v1656_v15, %v1617_v12  ;;  %v1658_v18 = vpop.f32.mrb[9].mxu0  ;;  %v1698_v19 = vpop.f32.mrb[9].mxu1 }
 0x15f   : > { %v1659_v20 = vpop.f32.mrb[10].mxu0  ;;  %v1699_v21 = vpop.f32.mrb[10].mxu1 }
 0x160   : > { %v1697_v22 = vadd.f32 %v1696_v16, %v1657_v17  ;;  %v1660_v23 = vpop.f32.mrb[11].mxu0  ;;  %v1700_v25 = vpop.f32.mrb[11].mxu1 }
 0x165   : > { %v1736_v26 = vpop.f32.mrb[12].mxu0  ;;  %v1776_v27 = vpop.f32.mrb[12].mxu1 }
 0x166   : > { %v1737_v28 = vadd.f32 %v1736_v26, %v1697_v22  ;;  %v1738_v29 = vpop.f32.mrb[13].mxu0  ;;  %v1778_v30 = vpop.f32.mrb[13].mxu1 }
 0x167   : > { %v1739_v31 = vpop.f32.mrb[14].mxu0  ;;  %v1779_v32 = vpop.f32.mrb[14].mxu1 }
 0x168   : > { %v1777_v33 = vadd.f32 %v1776_v27, %v1737_v28  ;;  %v1740_v34 = vpop.f32.mrb[15].mxu0  ;;  %v1780_v35 = vpop.f32.mrb[15].mxu1 }
 0x16d   : > { %v1816_v36 = vpop.f32.mrb[16].mxu0  ;;  %v1856_v37 = vpop.f32.mrb[16].mxu1 }
 0x16e   : > { %v1817_v38 = vadd.f32 %v1816_v36, %v1777_v33  ;;  %v1818_v39 = vpop.f32.mrb[17].mxu0  ;;  %v1858_v40 = vpop.f32.mrb[17].mxu1 }
 0x16f   : > { %v1819_v41 = vpop.f32.mrb[18].mxu0  ;;  %v1859_v42 = vpop.f32.mrb[18].mxu1 }
 0x170   : > { %v1857_v43 = vadd.f32 %v1856_v37, %v1817_v38  ;;  %v1820_v44 = vpop.f32.mrb[19].mxu0  ;;  %v1860_v45 = vpop.f32.mrb[19].mxu1 }
 0x175   : > { %v1896_v46 = vpop.f32.mrb[20].mxu0  ;;  %v1936_v47 = vpop.f32.mrb[20].mxu1 }
 0x176   : > { %v1897_v48 = vadd.f32 %v1896_v46, %v1857_v43  ;;  %v1898_v49 = vpop.f32.mrb[21].mxu0  ;;  %v1938_v50 = vpop.f32.mrb[21].mxu1 }
 0x177   : > { %v1899_v51 = vpop.f32.mrb[22].mxu0  ;;  %v1939_v52 = vpop.f32.mrb[22].mxu1 }
 0x178   : > { %v1937_v53 = vadd.f32 %v1936_v47, %v1897_v48  ;;  %v1900_v54 = vpop.f32.mrb[23].mxu0  ;;  %v1940_v55 = vpop.f32.mrb[23].mxu1 }
 0x17d   : > { %v1976_v56 = vpop.f32.mrb[24].mxu0  ;;  %v2016_v57 = vpop.f32.mrb[24].mxu1 }
 0x17e   : > { %v1977_v58 = vadd.f32 %v1976_v56, %v1937_v53  ;;  %v1978_v24 = vpop.f32.mrb[25].mxu0  ;;  %v2018_v59 = vpop.f32.mrb[25].mxu1 }
 0x17f   : > { %v1979_v60 = vpop.f32.mrb[26].mxu0  ;;  %v2019_v61 = vpop.f32.mrb[26].mxu1 }
 0x180   : > { %v2017_v62 = vadd.f32 %v2016_v57, %v1977_v58  ;;  %v1980_v63 = vpop.f32.mrb[27].mxu0  ;;  %v2020_v0 = vpop.f32.mrb[27].mxu1 }
 0x185   : > { %v2056_v1 = vpop.f32.mrb[28].mxu0  ;;  %v2096_v2 = vpop.f32.mrb[28].mxu1 }
 0x186   : > { %v2057_v3 = vadd.f32 %v2056_v1, %v2017_v62  ;;  %v2058_v4 = vpop.f32.mrb[29].mxu0  ;;  %v2098_v5 = vpop.f32.mrb[29].mxu1 }
 0x187   : > { %v2059_v6 = vpop.f32.mrb[30].mxu0  ;;  %v2099_v7 = vpop.f32.mrb[30].mxu1 }
 0x188   : > { %v2097_v8 = vadd.f32 %v2096_v2, %v2057_v3  ;;  %v2060_v9 = vpop.f32.mrb[31].mxu0  ;;  %v2100_v10 = vpop.f32.mrb[31].mxu1 }
 0x18d   : > { %v2136_v11 = vpop.f32.mrb[32].mxu0  ;;  %v2176_v12 = vpop.f32.mrb[32].mxu1 }
 0x18e   : > { %v2137_v13 = vadd.f32 %v2136_v11, %v2097_v8  ;;  %v2138_v14 = vpop.f32.mrb[33].mxu0  ;;  %v2178_v15 = vpop.f32.mrb[33].mxu1 }
 0x18f   : > { %v2139_v16 = vpop.f32.mrb[34].mxu0  ;;  %v2179_v17 = vpop.f32.mrb[34].mxu1 }
 0x190   : > { %v2177_v18 = vadd.f32 %v2176_v12, %v2137_v13  ;;  %v2140_v19 = vpop.f32.mrb[35].mxu0  ;;  %v2180_v20 = vpop.f32.mrb[35].mxu1 }
 0x195   : > { %v2216_v21 = vpop.f32.mrb[36].mxu0  ;;  %v2256_v22 = vpop.f32.mrb[36].mxu1 }
 0x196   : > { %v2217_v23 = vadd.f32 %v2216_v21, %v2177_v18  ;;  %v2218_v25 = vpop.f32.mrb[37].mxu0  ;;  %v2258_v26 = vpop.f32.mrb[37].mxu1 }
 0x197   : > { %v2219_v27 = vpop.f32.mrb[38].mxu0  ;;  %v2259_v28 = vpop.f32.mrb[38].mxu1 }
 0x198   : > { %v2257_v29 = vadd.f32 %v2256_v22, %v2217_v23  ;;  %v2220_v30 = vpop.f32.mrb[39].mxu0  ;;  %v2260_v31 = vpop.f32.mrb[39].mxu1 }
 0x19d   : > { %v2296_v32 = vpop.f32.mrb[40].mxu0  ;;  %v2336_v33 = vpop.f32.mrb[40].mxu1 }
 0x19e   : > { %v2297_v34 = vadd.f32 %v2296_v32, %v2257_v29  ;;  %v2298_v35 = vpop.f32.mrb[41].mxu0  ;;  %v2338_v36 = vpop.f32.mrb[41].mxu1 }
 0x19f   : > { %v2299_v37 = vpop.f32.mrb[42].mxu0  ;;  %v2339_v38 = vpop.f32.mrb[42].mxu1 }
 0x1a0   : > { %v2337_v39 = vadd.f32 %v2336_v33, %v2297_v34  ;;  %v2300_v40 = vpop.f32.mrb[43].mxu0  ;;  %v2340_v41 = vpop.f32.mrb[43].mxu1 }
 0x1a5   : > { %v2376_v42 = vpop.f32.mrb[44].mxu0  ;;  %v2416_v43 = vpop.f32.mrb[44].mxu1 }
 0x1a6   : > { %v2377_v44 = vadd.f32 %v2376_v42, %v2337_v39  ;;  %v2378_v45 = vpop.f32.mrb[45].mxu0  ;;  %v2418_v46 = vpop.f32.mrb[45].mxu1 }
 0x1a7   : > { %v2379_v47 = vpop.f32.mrb[46].mxu0  ;;  %v2419_v48 = vpop.f32.mrb[46].mxu1 }
 0x1a8   : > { %v2417_v49 = vadd.f32 %v2416_v43, %v2377_v44  ;;  %v2380_v50 = vpop.f32.mrb[47].mxu0  ;;  %v2420_v51 = vpop.f32.mrb[47].mxu1 }
 0x1ad   : > { %v2456_v52 = vpop.f32.mrb[48].mxu0  ;;  %v2496_v53 = vpop.f32.mrb[48].mxu1 }
 0x1ae   : > { %v2457_v54 = vadd.f32 %v2456_v52, %v2417_v49  ;;  %v2458_v55 = vpop.f32.mrb[49].mxu0  ;;  %v2498_v56 = vpop.f32.mrb[49].mxu1 }
 0x1af   : > { %v2459_v57 = vpop.f32.mrb[50].mxu0  ;;  %v2499_v58 = vpop.f32.mrb[50].mxu1 }
 0x1b0   : > { %v2497_v24 = vadd.f32 %v2496_v53, %v2457_v54  ;;  %v2460_v59 = vpop.f32.mrb[51].mxu0  ;;  %v2500_v60 = vpop.f32.mrb[51].mxu1 }
 0x1b5   : > { %v2536_v61 = vpop.f32.mrb[52].mxu0  ;;  %v2576_v62 = vpop.f32.mrb[52].mxu1 }
 0x1b6   : > { %v2537_v63 = vadd.f32 %v2536_v61, %v2497_v24  ;;  %v2538_v0 = vpop.f32.mrb[53].mxu0  ;;  %v2578_v1 = vpop.f32.mrb[53].mxu1 }
 0x1b7   : > { %v2539_v2 = vpop.f32.mrb[54].mxu0  ;;  %v2579_v3 = vpop.f32.mrb[54].mxu1 }
 0x1b8   : > { %v2577_v4 = vadd.f32 %v2576_v62, %v2537_v63  ;;  %v2540_v5 = vpop.f32.mrb[55].mxu0  ;;  %v2580_v6 = vpop.f32.mrb[55].mxu1 }
 0x1bd   : > { %v2616_v7 = vpop.f32.mrb[56].mxu0  ;;  %v2656_v8 = vpop.f32.mrb[56].mxu1 }
 0x1be   : > { %v2617_v9 = vadd.f32 %v2616_v7, %v2577_v4  ;;  %v2618_v10 = vpop.f32.mrb[57].mxu0  ;;  %v2658_v11 = vpop.f32.mrb[57].mxu1 }
 0x1bf   : > { %v2619_v12 = vpop.f32.mrb[58].mxu0  ;;  %v2659_v13 = vpop.f32.mrb[58].mxu1 }
 0x1c0   : > { %v2657_v14 = vadd.f32 %v2656_v8, %v2617_v9  ;;  %v2620_v15 = vpop.f32.mrb[59].mxu0  ;;  %v2660_v16 = vpop.f32.mrb[59].mxu1 }
 0x1c5   : > { %v2696_v17 = vpop.f32.mrb[60].mxu0  ;;  %v2736_v18 = vpop.f32.mrb[60].mxu1 }
 0x1c6   : > { %v2697_v19 = vadd.f32 %v2696_v17, %v2657_v14  ;;  %v2698_v20 = vpop.f32.mrb[61].mxu0  ;;  %v2738_v21 = vpop.f32.mrb[61].mxu1 }
 0x1c7   : > { %v2699_v22 = vpop.f32.mrb[62].mxu0  ;;  %v2739_v23 = vpop.f32.mrb[62].mxu1 }
 0x1c8   : > { %v2737_v25 = vadd.f32 %v2736_v18, %v2697_v19  ;;  %v2700_v26 = vpop.f32.mrb[63].mxu0  ;;  %v2740_v27 = vpop.f32.mrb[63].mxu1 }
 0x1cd   : > { %v2776_v28 = vpop.f32.mrb[64].mxu0  ;;  %v2816_v29 = vpop.f32.mrb[64].mxu1 }
 0x1ce   : > { %v2777_v30 = vadd.f32 %v2776_v28, %v2737_v25  ;;  %v2778_v31 = vpop.f32.mrb[65].mxu0  ;;  %v2818_v32 = vpop.f32.mrb[65].mxu1 }
 0x1cf   : > { %v2779_v33 = vpop.f32.mrb[66].mxu0  ;;  %v2819_v34 = vpop.f32.mrb[66].mxu1 }
 0x1d0   : > { %v2817_v35 = vadd.f32 %v2816_v29, %v2777_v30  ;;  %v2780_v36 = vpop.f32.mrb[67].mxu0  ;;  %v2820_v37 = vpop.f32.mrb[67].mxu1 }
 0x1d5   : > { %v2856_v38 = vpop.f32.mrb[68].mxu0  ;;  %v2896_v39 = vpop.f32.mrb[68].mxu1 }
 0x1d6   : > { %v2857_v40 = vadd.f32 %v2856_v38, %v2817_v35  ;;  %v2858_v41 = vpop.f32.mrb[69].mxu0  ;;  %v2898_v42 = vpop.f32.mrb[69].mxu1 }
 0x1d7   : > { %v2859_v43 = vpop.f32.mrb[70].mxu0  ;;  %v2899_v44 = vpop.f32.mrb[70].mxu1 }
 0x1d8   : > { %v2897_v45 = vadd.f32 %v2896_v39, %v2857_v40  ;;  %v2860_v46 = vpop.f32.mrb[71].mxu0  ;;  %v2900_v47 = vpop.f32.mrb[71].mxu1  ;;  %v237_v39 = vld [vmem:[%s4186_s29] sm:$0x3] }
 0x1dd   : > { %v2936_v48 = vpop.f32.mrb[72].mxu0  ;;  %v2976_v49 = vpop.f32.mrb[72].mxu1 }
 0x1de   : > { %v2937_v50 = vadd.f32 %v2936_v48, %v2897_v45  ;;  %v2938_v51 = vpop.f32.mrb[73].mxu0  ;;  %v2978_v52 = vpop.f32.mrb[73].mxu1 }
 0x1df   : > { %v2939_v53 = vpop.f32.mrb[74].mxu0  ;;  %v2979_v54 = vpop.f32.mrb[74].mxu1 }
 0x1e0   : > { %v2977_v55 = vadd.f32 %v2976_v49, %v2937_v50  ;;  %v2940_v56 = vpop.f32.mrb[75].mxu0  ;;  %v2980_v57 = vpop.f32.mrb[75].mxu1 }
 0x1e5   : > { %v3016_v58 = vpop.f32.mrb[76].mxu0  ;;  %v3056_v24 = vpop.f32.mrb[76].mxu1 }
 0x1e6   : > { %v3017_v59 = vadd.f32 %v3016_v58, %v2977_v55  ;;  %v3018_v60 = vpop.f32.mrb[77].mxu0  ;;  %v3058_v61 = vpop.f32.mrb[77].mxu1 }
 0x1e7   : > { %v3019_v62 = vpop.f32.mrb[78].mxu0  ;;  %v3059_v63 = vpop.f32.mrb[78].mxu1 }
 0x1e8   : > { %v3057_v0 = vadd.f32 %v3056_v24, %v3017_v59  ;;  %v3020_v1 = vpop.f32.mrb[79].mxu0  ;;  %v3060_v2 = vpop.f32.mrb[79].mxu1 }
 0x1ed   : > { %v3096_v3 = vpop.f32.mrb[80].mxu0  ;;  %v3136_v4 = vpop.f32.mrb[80].mxu1 }
 0x1ee   : > { %v3097_v5 = vadd.f32 %v3096_v3, %v3057_v0  ;;  %v3098_v6 = vpop.f32.mrb[81].mxu0  ;;  %v3138_v7 = vpop.f32.mrb[81].mxu1 }
 0x1ef   : > { %v3099_v8 = vpop.f32.mrb[82].mxu0  ;;  %v3139_v9 = vpop.f32.mrb[82].mxu1 }
 0x1f0   : > { %v3137_v10 = vadd.f32 %v3136_v4, %v3097_v5  ;;  %v3100_v11 = vpop.f32.mrb[83].mxu0  ;;  %v3140_v12 = vpop.f32.mrb[83].mxu1 }
 0x1f5   : > { %v3176_v13 = vpop.f32.mrb[84].mxu0  ;;  %v3216_v14 = vpop.f32.mrb[84].mxu1 }
 0x1f6   : > { %v3177_v15 = vadd.f32 %v3176_v13, %v3137_v10  ;;  %v3178_v16 = vpop.f32.mrb[85].mxu0  ;;  %v3218_v17 = vpop.f32.mrb[85].mxu1 }
 0x1f7   : > { %v3179_v18 = vpop.f32.mrb[86].mxu0  ;;  %v3219_v19 = vpop.f32.mrb[86].mxu1 }
 0x1f8   : > { %v3217_v20 = vadd.f32 %v3216_v14, %v3177_v15  ;;  %v3180_v21 = vpop.f32.mrb[87].mxu0  ;;  %v3220_v22 = vpop.f32.mrb[87].mxu1 }
 0x1fd   : > { %v3256_v23 = vpop.f32.mrb[88].mxu0  ;;  %v3296_v25 = vpop.f32.mrb[88].mxu1 }
 0x1fe   : > { %v3257_v26 = vadd.f32 %v3256_v23, %v3217_v20  ;;  %v3258_v27 = vpop.f32.mrb[89].mxu0  ;;  %v3298_v28 = vpop.f32.mrb[89].mxu1 }
 0x1ff   : > { %v3259_v29 = vpop.f32.mrb[90].mxu0  ;;  %v3299_v30 = vpop.f32.mrb[90].mxu1 }
 0x200   : > { %v3297_v31 = vadd.f32 %v3296_v25, %v3257_v26  ;;  %v3260_v32 = vpop.f32.mrb[91].mxu0  ;;  %v3300_v33 = vpop.f32.mrb[91].mxu1 }
 0x205   : > { %v3336_v34 = vpop.f32.mrb[92].mxu0  ;;  %v3376_v35 = vpop.f32.mrb[92].mxu1 }
 0x206   : > { %v3337_v36 = vadd.f32 %v3336_v34, %v3297_v31  ;;  %v3338_v37 = vpop.f32.mrb[93].mxu0  ;;  %v3378_v38 = vpop.f32.mrb[93].mxu1 }
 0x207   : > { %v3339_v40 = vpop.f32.mrb[94].mxu0  ;;  %v3379_v41 = vpop.f32.mrb[94].mxu1 }
 0x208   : > { %v3377_v42 = vadd.f32 %v3376_v35, %v3337_v36  ;;  %v3340_v43 = vpop.f32.mrb[95].mxu0  ;;  %v3380_v44 = vpop.f32.mrb[95].mxu1 }
 0x20a   : > { %v3382_v45 = vadd.f32 %v3377_v42, %v237_v39 }
 0x20c   : > { %3384 = vst.msk [vmem:[%s4186_s29] sm:$0x3] %vm3383_vm1, %v3382_v45 }
 0x20d   : > { %3837 = shalt.err (!%p3834_p2)
}
 0x20e   : > { %s3838_s22 = scalar_lea.hbm %s4366_s25, 32  ;;  %s3842_s26 = scalar_lea.hbm %s4433_s2, 64 }
 0x20f   : > { %p3839_p0 = scmp.ne.s32.totalorder %s4366_s25, %s3838_s22  ;;  %p3843_p9 = scmp.lt.u32.totalorder %s4366_s25, %s4433_s2 }
 0x210   : > { %p3844_p7 = scmp.lt.u32.totalorder %s3842_s26, %s3838_s22  ;;  %p3846_p5 = scmp.lt.u32.totalorder %s3838_s22, %s4366_s25 }
 0x211   : > { %p3840_p4 = pnand %p3839_p0, %p4451_p12 }
 0x212   : > { %p3845_p3 = por %p3844_p7, %p3843_p9 }
 0x213   : > { %p3841_p6 = pneg %p3840_p4 }
 0x214   : > { %p3847_p1 = por %p3846_p5, %p3845_p3 }
 0x216   : > { %p3848_p10 = pnand %p3847_p1, %p3841_p6 }
 0x218   : > { %3851 = shalt.err (!%p3848_p10)
}
 0x219   : > { %3632 = dma.vmem_to_hbm [thread:$0]  (%p4451_p12), %s4368_s28, 32, %s4366_s25, %s3386_s5  }
 0x21a PF: > { %p3646_p11 = scmp.ge.s32.totalorder %s3950_s19, 2  ;;  %s3411_s4 = sand.u32 1, %s3910_s9  }
 0x21b   : > { %p4452_p8 = scmp.ne.s32.totalorder %s4447_s24, 0  ;;  %s3412_s29 = scalar_lea.sflag [#allocation4], %s3411_s4 }
 0x21d   : > { %p3642_p13 = pnand %p3646_p11, %p4452_p8 }
 0x21f   : > { %3905 = dma.done.wait (!%p3642_p13), %s3412_s29, 32  }
 0x220   : > { %3907 = vsyncadd (!%p3642_p13), %s3412_s29, 4294967264  ;;  %s21_s19 = sadd.s32 1, %s3950_s19   ;;  %s4453_s15 = sld [smem:[#allocation11_spill]] }
 0x221   : > { %p18_p2 = scmp.ge.s32.totalorder %s21_s19, 18   ;;  %s4454_s16 = sld [smem:[#allocation12_spill]] }
 0x222   : > { %s4455_s17 = sld [smem:[#allocation13_spill]]  ;;  %s4456_s18 = sld [smem:[#allocation14_spill]] }
 0x223   : > { %s4457_s9 = smov %s3914_s10  ;;  %s4458_s10 = smov %s3918_s11 }
 0x224   : > { %s4459_s11 = smov %s4063_s6  ;;  %s4460_s12 = smov %s3926_s13 }
 0x225   : > { %s4461_s13 = smov %s3930_s14  ;;  %s4462_s14 = smov %s4066_s7 }
 0x226   :  { %20 = sbr.rel (!%p18_p2) target bundleno = 11 (0xb), region = 90 }
 0x22d   :  { %3417 = vsyncpa [#allocation3], 1 }
 0x22e   :  { %3419 = vsyncpa [#allocation3 + $0x1], 1 }
 0x22f   :  { %3420 = vsyncpa [#allocation6], 1 }
 0x230   :  { %3422 = vsyncpa [#allocation6 + $0x1], 1 }
 0x231   :  { %3423 = vsyncpa [#allocation4], 1 }
 0x232   :  { %3425 = vsyncpa [#allocation4 + $0x1], 1 }

</bundles_post_ra>
